<compile_context>
chip_gen: v6e
topology: v6e:2x2x1
jax: 0.10.0
libtpu: 0.0.40
codegen_flags: <defaults>
</compile_context>

<pallas_src>
import functools

import jax
import jax.numpy as jnp
from jax.experimental import pallas as pl
from jax.experimental.pallas import tpu as pltpu


def _cve_kernel(x_ref, par_ref, w2b_ref, red_ref, o_ref, *, max_value, n_pack):
    # x_ref:   (R, P)     P tokens packed per row (row-major over tokens)
    # par_ref: (4+P, W)   rows 0..3 = b1, b2, gamma, beta (each tiled P times
    #                     along lanes); rows 4..4+P = E, the linear1 broadcast
    #                     matrix with w1 baked in (E[k, k*D+d] = w1[d]).
    # w2b_ref: (W, W)     kron(I_P, W2^T)            (block-diagonal linear2)
    # red_ref: (W, W)     kron(I_P, ones(D, D) / D)  (segmented mean)
    # o_ref:   (R, W)     lane-dense output: P tokens * D features per row
    x = jnp.minimum(x_ref[...], max_value)          # torch.clamp(x, max=max_value)

    b1 = par_ref[0:1, :]
    b2 = par_ref[1:2, :]
    gamma = par_ref[2:3, :]
    beta = par_ref[3:4, :]

    # linear1 (in_features = 1): broadcast each token value across its D lanes
    # and scale by w1.  For P > 1 this is a tiny-K matmul that also performs
    # the token->lane-group broadcast; for P == 1 keep the VPU broadcast form.
    if n_pack == 1:
        h = x * par_ref[4:5, :] + b1
    else:
        E = par_ref[4:4 + n_pack, :]
        h = jnp.dot(x, E, preferred_element_type=jnp.float32) + b1
    h = jnp.maximum(h, 0.0)                         # ReLU

    # linear2 as a block-diagonal MXU matmul (stays lane-dense).
    y = jnp.dot(h, w2b_ref[...], preferred_element_type=jnp.float32) + b2

    # LayerNorm over each D-lane group (eps = 1e-5, PyTorch default).
    # Segmented mean / variance via the block-diagonal averaging matrix.
    mean = jnp.dot(y, red_ref[...], preferred_element_type=jnp.float32)
    c = y - mean
    var = jnp.dot(c * c, red_ref[...], preferred_element_type=jnp.float32)
    out = c * jax.lax.rsqrt(var + 1e-5) * gamma + beta

    # TODO(synk): nn.Dropout(p=0.1) omitted — inference-mode identity.
    o_ref[...] = out.astype(o_ref.dtype)


def continuous_value_encoder(x, w1, b1, w2, b2, gamma, beta, max_value=512.0,
                             tok_tile=2048, out_dtype=jnp.float32):
    """x: [B, S] float -> [B, S, D]."""
    B, S = x.shape
    D = w1.shape[0]
    assert (D <= 128 and 128 % D == 0) or (D % 128 == 0), \
        "d_model must divide 128 or be a multiple of 128"

    P = 128 // D if D < 128 else 1      # tokens packed per lane-dense row
    W = P * D                           # lane width of a packed row (>= 128)

    # Tokens per grid step; keep the row tile a multiple of 8 sublanes.
    tok_tile = max(8 * P, (tok_tile // (8 * P)) * (8 * P))
    R = tok_tile // P                   # rows per grid step

    N = B * S
    n_steps = pl.cdiv(N, tok_tile)
    N_pad = n_steps * tok_tile

    xf = x.reshape(N).astype(jnp.float32)
    if N_pad != N:
        xf = jnp.pad(xf, (0, N_pad - N))
    x2d = xf.reshape(N_pad // P, P)

    f32 = jnp.float32
    eye = jnp.eye(P, dtype=f32)
    E = jnp.kron(eye, w1.reshape(1, D).astype(f32))          # (P, W)
    params = jnp.concatenate([
        jnp.tile(b1.reshape(1, D).astype(f32), (1, P)),
        jnp.tile(b2.reshape(1, D).astype(f32), (1, P)),
        jnp.tile(gamma.reshape(1, D).astype(f32), (1, P)),
        jnp.tile(beta.reshape(1, D).astype(f32), (1, P)),
        E,
    ], axis=0)                                               # (4 + P, W)
    w2_blk = jnp.kron(eye, w2.T.astype(f32))                 # (W, W)
    red_blk = jnp.kron(eye, jnp.full((D, D), 1.0 / D, f32))  # (W, W)

    kernel = functools.partial(_cve_kernel, max_value=float(max_value),
                               n_pack=P)

    out2d = pl.pallas_call(
        kernel,
        out_shape=jax.ShapeDtypeStruct((N_pad // P, W), out_dtype),
        grid_spec=pltpu.PrefetchScalarGridSpec(
            num_scalar_prefetch=0,
            grid=(n_steps,),
            in_specs=[
                pl.BlockSpec((R, P), lambda i: (i, 0)),        # packed x
                pl.BlockSpec((4 + P, W), lambda i: (0, 0)),    # fused params
                pl.BlockSpec((W, W), lambda i: (0, 0)),        # block-diag W2^T
                pl.BlockSpec((W, W), lambda i: (0, 0)),        # segmented mean
            ],
            out_specs=pl.BlockSpec((R, W), lambda i: (i, 0)),  # lane-dense out
        ),
        compiler_params=pltpu.CompilerParams(
            dimension_semantics=("parallel",)),
    )(x2d, params, w2_blk, red_blk)

    # Pure row-major view back to (B, S, D); drop padded tokens.
    return out2d.reshape(N_pad, D)[:N].reshape(B, S, D)


def _reference(x, w1, b1, w2, b2, gamma, beta, max_value=512.0):
    x = jnp.minimum(x[..., None], max_value)
    h = jax.nn.relu(x * w1.reshape(1, 1, -1) + b1)
    y = jnp.einsum("bsd,ed->bse", h, w2) + b2
    mean = jnp.mean(y, axis=-1, keepdims=True)
    var = jnp.mean((y - mean) ** 2, axis=-1, keepdims=True)
    return (y - mean) * jax.lax.rsqrt(var + 1e-5) * gamma + beta


if __name__ == "__main__":
    D = 32
    key = jax.random.PRNGKey(0)
    kx, k1, k2, k3, k4, kx2 = jax.random.split(key, 6)

    # Parameters (shapes from nn.Linear / nn.LayerNorm).
    w1 = jax.random.normal(k1, (D, 1)) * 0.5                 # Linear(1, D).weight
    b1 = jax.random.normal(k2, (D,)) * 0.1                   # Linear(1, D).bias
    w2 = jax.random.normal(k3, (D, D)) * (1.0 / jnp.sqrt(D)) # Linear(D, D).weight
    b2 = jax.random.normal(k4, (D,)) * 0.1                   # Linear(D, D).bias
    gamma = jnp.ones((D,), jnp.float32)                      # LayerNorm.weight
    beta = jnp.zeros((D,), jnp.float32)                      # LayerNorm.bias

    # Small test (exercises the padded final tile: 16 tokens << tok_tile).
    B, S = 2, 8
    x = jax.random.uniform(kx, (B, S), minval=0.0, maxval=600.0)  # some > clamp
    out = continuous_value_encoder(x, w1, b1, w2, b2, gamma, beta, max_value=512.0)
    out = jax.block_until_ready(out)
    ref = _reference(x, w1, b1, w2, b2, gamma, beta, max_value=512.0)
    assert out.shape == (B, S, D)
    assert jnp.allclose(out, ref, atol=5e-4, rtol=5e-4), "mismatch vs reference (small)"

    # Larger test (exercises a multi-step grid, no padding).
    B2, S2 = 4, 1024
    x2 = jax.random.uniform(kx2, (B2, S2), minval=0.0, maxval=600.0)
    out2 = continuous_value_encoder(x2, w1, b1, w2, b2, gamma, beta, max_value=512.0)
    out2 = jax.block_until_ready(out2)
    ref2 = _reference(x2, w1, b1, w2, b2, gamma, beta, max_value=512.0)
    assert out2.shape == (B2, S2, D)
    assert jnp.allclose(out2, ref2, atol=5e-4, rtol=5e-4), "mismatch vs reference (large)"

    print("KERNEL_OK")
</pallas_src>

<mosaic_0001>
module attributes {stable_mosaic.version = 11 : i64} {
  func.func @_cve_kernel(%arg0: i32, %arg1: memref<512x4xf32, #tpu.memory_space<vmem>>, %arg2: memref<8x128xf32, #tpu.memory_space<vmem>>, %arg3: memref<128x128xf32, #tpu.memory_space<vmem>>, %arg4: memref<128x128xf32, #tpu.memory_space<vmem>>, %arg5: memref<512x128xf32, #tpu.memory_space<vmem>>) attributes {dimension_semantics = [#tpu.dimension_semantics<parallel>], iteration_bounds = array<i64: 1>, scalar_prefetch = 0 : i64, scratch_operands = 0 : i64, tpu.core_type = #tpu.core_type<tc>, window_params = [{transform_indices = @transform_0, window_bounds = array<i64: 512, 4>}, {pipeline_mode = #tpu.pipeline_mode<synchronous>, transform_indices = @transform_1, window_bounds = array<i64: 8, 128>}, {pipeline_mode = #tpu.pipeline_mode<synchronous>, transform_indices = @transform_2, window_bounds = array<i64: 128, 128>}, {pipeline_mode = #tpu.pipeline_mode<synchronous>, transform_indices = @transform_3, window_bounds = array<i64: 128, 128>}, {transform_indices = @transform_4, window_bounds = array<i64: 512, 128>}]} {
    %c0 = arith.constant 0 : index
    %c0_0 = arith.constant 0 : index
    %0 = vector.load %arg1[%c0, %c0_0] : memref<512x4xf32, #tpu.memory_space<vmem>>, vector<512x4xf32>
    %cst = arith.constant 5.120000e+02 : f32
    %1 = vector.broadcast %cst : f32 to vector<512x4xf32>
    %2 = arith.minimumf %0, %1 : vector<512x4xf32>
    %c0_1 = arith.constant 0 : index
    %c0_2 = arith.constant 0 : index
    %3 = vector.load %arg2[%c0_1, %c0_2] : memref<8x128xf32, #tpu.memory_space<vmem>>, vector<1x128xf32>
    %c1 = arith.constant 1 : index
    %c0_3 = arith.constant 0 : index
    %4 = vector.load %arg2[%c1, %c0_3] : memref<8x128xf32, #tpu.memory_space<vmem>>, vector<1x128xf32>
    %c2 = arith.constant 2 : index
    %c0_4 = arith.constant 0 : index
    %5 = vector.load %arg2[%c2, %c0_4] : memref<8x128xf32, #tpu.memory_space<vmem>>, vector<1x128xf32>
    %c3 = arith.constant 3 : index
    %c0_5 = arith.constant 0 : index
    %6 = vector.load %arg2[%c3, %c0_5] : memref<8x128xf32, #tpu.memory_space<vmem>>, vector<1x128xf32>
    %c4 = arith.constant 4 : index
    %c0_6 = arith.constant 0 : index
    %7 = vector.load %arg2[%c4, %c0_6] : memref<8x128xf32, #tpu.memory_space<vmem>>, vector<4x128xf32>
    %cst_7 = arith.constant dense<0.000000e+00> : vector<512x128xf32>
    %8 = tpu.matmul %2, %7, %cst_7 {dimension_numbers = #tpu.dot_dimension_numbers<[1], [0], [0], [1], [0, 0, 1, 1], [], []>} : vector<512x4xf32>, vector<4x128xf32>, vector<512x128xf32> -> vector<512x128xf32>
    %9 = vector.broadcast %3 : vector<1x128xf32> to vector<512x128xf32>
    %10 = arith.addf %8, %9 : vector<512x128xf32>
    %cst_8 = arith.constant 0.000000e+00 : f32
    %11 = vector.broadcast %cst_8 : f32 to vector<512x128xf32>
    %12 = arith.maximumf %10, %11 : vector<512x128xf32>
    %c0_9 = arith.constant 0 : index
    %c0_10 = arith.constant 0 : index
    %13 = vector.load %arg3[%c0_9, %c0_10] : memref<128x128xf32, #tpu.memory_space<vmem>>, vector<128x128xf32>
    %cst_11 = arith.constant dense<0.000000e+00> : vector<512x128xf32>
    %14 = tpu.matmul %12, %13, %cst_11 {dimension_numbers = #tpu.dot_dimension_numbers<[1], [0], [0], [1], [0, 0, 1, 1], [], []>} : vector<512x128xf32>, vector<128x128xf32>, vector<512x128xf32> -> vector<512x128xf32>
    %15 = vector.broadcast %4 : vector<1x128xf32> to vector<512x128xf32>
    %16 = arith.addf %14, %15 : vector<512x128xf32>
    %c0_12 = arith.constant 0 : index
    %c0_13 = arith.constant 0 : index
    %17 = vector.load %arg4[%c0_12, %c0_13] : memref<128x128xf32, #tpu.memory_space<vmem>>, vector<128x128xf32>
    %cst_14 = arith.constant dense<0.000000e+00> : vector<512x128xf32>
    %18 = tpu.matmul %16, %17, %cst_14 {dimension_numbers = #tpu.dot_dimension_numbers<[1], [0], [0], [1], [0, 0, 1, 1], [], []>} : vector<512x128xf32>, vector<128x128xf32>, vector<512x128xf32> -> vector<512x128xf32>
    %19 = arith.subf %16, %18 : vector<512x128xf32>
    %20 = arith.mulf %19, %19 : vector<512x128xf32>
    %c0_15 = arith.constant 0 : index
    %c0_16 = arith.constant 0 : index
    %21 = vector.load %arg4[%c0_15, %c0_16] : memref<128x128xf32, #tpu.memory_space<vmem>>, vector<128x128xf32>
    %cst_17 = arith.constant dense<0.000000e+00> : vector<512x128xf32>
    %22 = tpu.matmul %20, %21, %cst_17 {dimension_numbers = #tpu.dot_dimension_numbers<[1], [0], [0], [1], [0, 0, 1, 1], [], []>} : vector<512x128xf32>, vector<128x128xf32>, vector<512x128xf32> -> vector<512x128xf32>
    %cst_18 = arith.constant 9.99999974E-6 : f32
    %23 = vector.broadcast %cst_18 : f32 to vector<512x128xf32>
    %24 = arith.addf %22, %23 : vector<512x128xf32>
    %25 = math.rsqrt %24 : vector<512x128xf32>
    %26 = arith.mulf %19, %25 : vector<512x128xf32>
    %27 = vector.broadcast %5 : vector<1x128xf32> to vector<512x128xf32>
    %28 = arith.mulf %26, %27 : vector<512x128xf32>
    %29 = vector.broadcast %6 : vector<1x128xf32> to vector<512x128xf32>
    %30 = arith.addf %28, %29 : vector<512x128xf32>
    %c0_19 = arith.constant 0 : index
    %c0_20 = arith.constant 0 : index
    %31 = vector.load %arg5[%c0_19, %c0_20] : memref<512x128xf32, #tpu.memory_space<vmem>>, vector<512x128xf32>
    tpu.vector_store %arg5[%c0_19, %c0_20], %30 {strides = array<i32>} : memref<512x128xf32, #tpu.memory_space<vmem>>, vector<512x128xf32>,
    return
  }
  func.func @transform_0(%arg0: i32) -> (i32, i32) {
    %c0_i32 = arith.constant 0 : i32
    %c0_i32_0 = arith.constant 0 : i32
    return %arg0, %c0_i32 : i32, i32
  }
  func.func @transform_1(%arg0: i32) -> (i32, i32) {
    %c0_i32 = arith.constant 0 : i32
    %c0_i32_0 = arith.constant 0 : i32
    %c0_i32_1 = arith.constant 0 : i32
    return %c0_i32, %c0_i32_0 : i32, i32
  }
  func.func @transform_2(%arg0: i32) -> (i32, i32) {
    %c0_i32 = arith.constant 0 : i32
    %c0_i32_0 = arith.constant 0 : i32
    %c0_i32_1 = arith.constant 0 : i32
    return %c0_i32, %c0_i32_0 : i32, i32
  }
  func.func @transform_3(%arg0: i32) -> (i32, i32) {
    %c0_i32 = arith.constant 0 : i32
    %c0_i32_0 = arith.constant 0 : i32
    %c0_i32_1 = arith.constant 0 : i32
    return %c0_i32, %c0_i32_0 : i32, i32
  }
  func.func @transform_4(%arg0: i32) -> (i32, i32) {
    %c0_i32 = arith.constant 0 : i32
    %c0_i32_0 = arith.constant 0 : i32
    return %arg0, %c0_i32 : i32, i32
  }
}

</mosaic_0001>

<bundles_post_ra>
// kernel: tpu_custom_call.1
= control target key start
LH: loop header
LB: loop body
LE: loop exit
PB: predicated region body
PF: predicated region fallthrough
CT: control target
= control target key end

     0   :  { %vm348_vm0 = vcmask 1043456   ;;  %vm155_vm1 = vcmask 31744   ;;  %s4871_s0 = inlined_call_operand.vmem [shape: f32[512,4], index: 0, kind: input, shape index: {}]   ;;  %s4872_s1 = inlined_call_operand.vmem [shape: f32[8,128], index: 1, kind: input, shape index: {}]   ;;  %s4873_s2 = inlined_call_operand.vmem [shape: f32[128,128], index: 2, kind: input, shape index: {}]   ;;  %s4874_s3 = inlined_call_operand.vmem [shape: f32[128,128], index: 3, kind: input, shape index: {}]   ;;  %s4875_s4 = inlined_call_operand.hbm [shape: f32[512,128], index: 4, kind: output, shape index: {}]  }
   0x1   :  { %v150_v0 = vld [vmem:[%s4872_s1 + $0x4] sm:$0xf]  ;;  %v19_v2 = vld [vmem:[%s4871_s0 + $0x8] sm:$0xff]  ;;  %v20_v5 = vld [vmem:[%s4871_s0 + $0x10] sm:$0xff] }
   0x2   :  { %v18_v1 = vld [vmem:[%s4871_s0] sm:$0xff]  ;;  %2838 = vmatprep.subr.msk.mxu0 %vm348_vm0, %v150_v0  ;;  %v83_v4 = vmin.f32 %v19_v2, 512.0  ;;  %v21_v6 = vld [vmem:[%s4871_s0 + $0x18] sm:$0xff]  ;;  %v84_v7 = vmin.f32 %v20_v5, 512.0  ;;  %v23_v11 = vld [vmem:[%s4871_s0 + $0x28] sm:$0xff] }
   0x3   :  { %v82_v3 = vmin.f32 %v18_v1, 512.0  ;;  %2839 = vmatpush3.msk.msra.mxu0 %vm348_vm0, %v150_v0  ;;  %v22_v8 = vld [vmem:[%s4871_s0 + $0x20] sm:$0xff]  ;;  %v85_v9 = vmin.f32 %v21_v6, 512.0  ;;  %v24_v12 = vld [vmem:[%s4871_s0 + $0x30] sm:$0xff]  ;;  %v87_v13 = vmin.f32 %v23_v11, 512.0  ;;  %v25_v15 = vld [vmem:[%s4871_s0 + $0x38] sm:$0xff] }
   0x4   :  { %v86_v10 = vmin.f32 %v22_v8, 512.0  ;;  %v88_v14 = vmin.f32 %v24_v12, 512.0  ;;  %v26_v16 = vld [vmem:[%s4871_s0 + $0x40] sm:$0xff]  ;;  %v89_v17 = vmin.f32 %v25_v15, 512.0  ;;  %v27_v19 = vld [vmem:[%s4871_s0 + $0x48] sm:$0xff]  ;;  %v28_v20 = vld [vmem:[%s4871_s0 + $0x50] sm:$0xff] }
   0x5   :  { %2840 = vmatprep.mubr.msk.f32.mxu0 %vm155_vm1, %v82_v3  ;;  %v90_v18 = vmin.f32 %v26_v16, 512.0  ;;  %v91_v21 = vmin.f32 %v27_v19, 512.0  ;;  %v92_v22 = vmin.f32 %v28_v20, 512.0  ;;  %v29_v23 = vld [vmem:[%s4871_s0 + $0x58] sm:$0xff]  ;;  %v30_v24 = vld [vmem:[%s4871_s0 + $0x60] sm:$0xff]  ;;  %v31_v27 = vld [vmem:[%s4871_s0 + $0x68] sm:$0xff] }
   0x6   :  { %2841 = vmatmul.mubr.msk.f32.vlgmr.msra.gmra.mxu0 %vm155_vm1, %v83_v4  ;;  %v93_v25 = vmin.f32 %v29_v23, 512.0  ;;  %v94_v26 = vmin.f32 %v30_v24, 512.0  ;;  %v816_v28 = vld [vmem:[%s4873_s2 + $0x78] sm:$0xff]  ;;  %v32_v29 = vld [vmem:[%s4871_s0 + $0x70] sm:$0xff]  ;;  %v814_v31 = vld [vmem:[%s4873_s2 + $0x68] sm:$0xff]  ;;  %v95_v32 = vmin.f32 %v31_v27, 512.0 }
   0x7   :  { %2843 = vmatprep.mubr.msk.f32.mxu0 %vm155_vm1, %v84_v7  ;;  %2936 = vmatprep.subr.mxu1 %v816_v28  ;;  %v815_v30 = vld [vmem:[%s4873_s2 + $0x70] sm:$0xff]  ;;  %v96_v33 = vmin.f32 %v32_v29, 512.0  ;;  %v33_v34 = vld [vmem:[%s4871_s0 + $0x78] sm:$0xff]  ;;  %v813_v35 = vld [vmem:[%s4873_s2 + $0x60] sm:$0xff] }
   0x8   :  { %2937 = vmatpush3.msra.mxu1 %v816_v28 }
   0x9   :  { %2938 = vmatprep.subr.mxu1 %v815_v30 }
   0xa   :  { %2844 = vmatmul.mubr.msk.f32.gmra.mxu0 %vm155_vm1, %v85_v9  ;;  %2939 = vmatpush3.msra.mxu1 %v815_v30 }
   0xb   :  { %2846 = vmatprep.mubr.msk.f32.mxu0 %vm155_vm1, %v86_v10 }
   0xe   :  { %2847 = vmatmul.mubr.msk.f32.gmra.mxu0 %vm155_vm1, %v87_v13 }
   0xf   :  { %2849 = vmatprep.mubr.msk.f32.mxu0 %vm155_vm1, %v88_v14 }
  0x12   :  { %2850 = vmatmul.mubr.msk.f32.gmra.mxu0 %vm155_vm1, %v89_v17 }
  0x13   :  { %2852 = vmatprep.mubr.msk.f32.mxu0 %vm155_vm1, %v90_v18 }
  0x16   :  { %2853 = vmatmul.mubr.msk.f32.gmra.mxu0 %vm155_vm1, %v91_v21 }
  0x17   :  { %2855 = vmatprep.mubr.msk.f32.mxu0 %vm155_vm1, %v92_v22 }
  0x1a   :  { %2856 = vmatmul.mubr.msk.f32.gmra.mxu0 %vm155_vm1, %v93_v25 }
  0x1b   :  { %2858 = vmatprep.mubr.msk.f32.mxu0 %vm155_vm1, %v94_v26 }
  0x1c   :  { %9 = vsyncpa [#allocation3], 0  ;;  %v34_v36 = vld [vmem:[%s4871_s0 + $0x80] sm:$0xff]  ;;  %2940 = vmatprep.subr.mxu1 %v814_v31  ;;  %v812_v37 = vld [vmem:[%s4873_s2 + $0x58] sm:$0xff]  ;;  %v97_v38 = vmin.f32 %v33_v34, 512.0 }
  0x1d   :  { %2941 = vmatpush3.msra.mxu1 %v814_v31  ;;  %v98_v39 = vmin.f32 %v34_v36, 512.0  ;;  %v35_v40 = vld [vmem:[%s4871_s0 + $0x88] sm:$0xff]  ;;  %v811_v41 = vld [vmem:[%s4873_s2 + $0x50] sm:$0xff]  ;;  %v37_v46 = vld [vmem:[%s4871_s0 + $0x98] sm:$0xff] }
  0x1e   :  { %2859 = vmatmul.mubr.msk.f32.gmra.mxu0 %vm155_vm1, %v95_v32  ;;  %2942 = vmatprep.subr.mxu1 %v813_v35  ;;  %v36_v42 = vld [vmem:[%s4871_s0 + $0x90] sm:$0xff]  ;;  %v810_v43 = vld [vmem:[%s4873_s2 + $0x48] sm:$0xff]  ;;  %v99_v44 = vmin.f32 %v35_v40, 512.0  ;;  %v809_v47 = vld [vmem:[%s4873_s2 + $0x40] sm:$0xff]  ;;  %v101_v50 = vmin.f32 %v37_v46, 512.0 }
  0x1f   :  { %2861 = vmatprep.mubr.msk.f32.mxu0 %vm155_vm1, %v96_v33  ;;  %2943 = vmatpush3.msra.mxu1 %v813_v35  ;;  %v100_v45 = vmin.f32 %v36_v42, 512.0  ;;  %v38_v48 = vld [vmem:[%s4871_s0 + $0xa0] sm:$0xff]  ;;  %v808_v49 = vld [vmem:[%s4873_s2 + $0x38] sm:$0xff]  ;;  %v39_v52 = vld [vmem:[%s4871_s0 + $0xa8] sm:$0xff] }
  0x20   :  { %2944 = vmatprep.subr.mxu1 %v812_v37  ;;  %v102_v51 = vmin.f32 %v38_v48, 512.0  ;;  %v807_v53 = vld [vmem:[%s4873_s2 + $0x30] sm:$0xff]  ;;  %v806_v55 = vld [vmem:[%s4873_s2 + $0x28] sm:$0xff]  ;;  %v103_v56 = vmin.f32 %v39_v52, 512.0  ;;  %v41_v58 = vld [vmem:[%s4871_s0 + $0xb8] sm:$0xff] }
  0x21   :  { %2945 = vmatpush3.msra.mxu1 %v812_v37  ;;  %v40_v54 = vld [vmem:[%s4871_s0 + $0xb0] sm:$0xff]  ;;  %v805_v59 = vld [vmem:[%s4873_s2 + $0x20] sm:$0xff]  ;;  %v105_v61 = vmin.f32 %v41_v58, 512.0  ;;  %v43_v63 = vld [vmem:[%s4871_s0 + $0xc8] sm:$0xff] }
  0x22   :  { %2862 = vmatmul.mubr.msk.f32.gmra.mxu0 %vm155_vm1, %v97_v38  ;;  %2946 = vmatprep.subr.mxu1 %v811_v41  ;;  %v104_v57 = vmin.f32 %v40_v54, 512.0  ;;  %v42_v60 = vld [vmem:[%s4871_s0 + $0xc0] sm:$0xff]  ;;  %v44_v0 = vld [vmem:[%s4871_s0 + $0xd0] sm:$0xff]  ;;  %v107_v1 = vmin.f32 %v43_v63, 512.0  ;;  %v45_v3 = vld [vmem:[%s4871_s0 + $0xd8] sm:$0xff] }
  0x23   :  { %2864 = vmatprep.mubr.msk.f32.mxu0 %vm155_vm1, %v98_v39  ;;  %2947 = vmatpush3.msra.mxu1 %v811_v41  ;;  %v106_v62 = vmin.f32 %v42_v60, 512.0  ;;  %v108_v2 = vmin.f32 %v44_v0, 512.0  ;;  %v46_v4 = vld [vmem:[%s4871_s0 + $0xe0] sm:$0xff]  ;;  %v109_v5 = vmin.f32 %v45_v3, 512.0  ;;  %v47_v7 = vld [vmem:[%s4871_s0 + $0xe8] sm:$0xff]  ;;  %v48_v8 = vld [vmem:[%s4871_s0 + $0xf0] sm:$0xff] }
  0x24   :  { %2948 = vmatprep.subr.mxu1 %v810_v43  ;;  %v110_v6 = vmin.f32 %v46_v4, 512.0  ;;  %v111_v9 = vmin.f32 %v47_v7, 512.0  ;;  %v112_v10 = vmin.f32 %v48_v8, 512.0  ;;  %v49_v11 = vld [vmem:[%s4871_s0 + $0xf8] sm:$0xff]  ;;  %v50_v12 = vld [vmem:[%s4871_s0 + $0x100] sm:$0xff]  ;;  %v51_v15 = vld [vmem:[%s4871_s0 + $0x108] sm:$0xff] }
  0x25   :  { %2949 = vmatpush3.msra.mxu1 %v810_v43  ;;  %v113_v13 = vmin.f32 %v49_v11, 512.0  ;;  %v114_v14 = vmin.f32 %v50_v12, 512.0  ;;  %v52_v16 = vld [vmem:[%s4871_s0 + $0x110] sm:$0xff]  ;;  %v115_v17 = vmin.f32 %v51_v15, 512.0  ;;  %v53_v19 = vld [vmem:[%s4871_s0 + $0x118] sm:$0xff]  ;;  %v54_v20 = vld [vmem:[%s4871_s0 + $0x120] sm:$0xff] }
  0x26   :  { %2865 = vmatmul.mubr.msk.f32.gmra.mxu0 %vm155_vm1, %v99_v44  ;;  %2950 = vmatprep.subr.mxu1 %v809_v47  ;;  %v116_v18 = vmin.f32 %v52_v16, 512.0  ;;  %v804_v21 = vld [vmem:[%s4873_s2 + $0x18] sm:$0xff]  ;;  %v117_v22 = vmin.f32 %v53_v19, 512.0  ;;  %v118_v23 = vmin.f32 %v54_v20, 512.0  ;;  %v55_v24 = vld [vmem:[%s4871_s0 + $0x128] sm:$0xff]  ;;  %v803_v25 = vld [vmem:[%s4873_s2 + $0x10] sm:$0xff] }
  0x27   :  { %2867 = vmatprep.mubr.msk.f32.mxu0 %vm155_vm1, %v100_v45  ;;  %2951 = vmatpush3.msra.mxu1 %v809_v47  ;;  %v56_v26 = vld [vmem:[%s4871_s0 + $0x130] sm:$0xff]  ;;  %v802_v27 = vld [vmem:[%s4873_s2 + $0x8] sm:$0xff]  ;;  %v119_v28 = vmin.f32 %v55_v24, 512.0  ;;  %v57_v30 = vld [vmem:[%s4871_s0 + $0x138] sm:$0xff] }
  0x28   :  { %2952 = vmatprep.subr.mxu1 %v808_v49  ;;  %v120_v29 = vmin.f32 %v56_v26, 512.0  ;;  %v801_v31 = vld [vmem:[%s4873_s2] sm:$0xff]  ;;  %v121_v33 = vmin.f32 %v57_v30, 512.0  ;;  %v59_v35 = vld [vmem:[%s4871_s0 + $0x148] sm:$0xff]  ;;  %v60_v36 = vld [vmem:[%s4871_s0 + $0x150] sm:$0xff] }
  0x29   :  { %2953 = vmatpush3.msra.mxu1 %v808_v49  ;;  %v58_v32 = vld [vmem:[%s4871_s0 + $0x140] sm:$0xff]  ;;  %v123_v37 = vmin.f32 %v59_v35, 512.0  ;;  %v124_v38 = vmin.f32 %v60_v36, 512.0  ;;  %v61_v39 = vld [vmem:[%s4871_s0 + $0x158] sm:$0xff]  ;;  %v63_v43 = vld [vmem:[%s4871_s0 + $0x168] sm:$0xff] }
  0x2a   :  { %2868 = vmatmul.mubr.msk.f32.gmra.mxu0 %vm155_vm1, %v101_v50  ;;  %2954 = vmatprep.subr.mxu1 %v807_v53  ;;  %v122_v34 = vmin.f32 %v58_v32, 512.0  ;;  %v62_v40 = vld [vmem:[%s4871_s0 + $0x160] sm:$0xff]  ;;  %v125_v41 = vmin.f32 %v61_v39, 512.0  ;;  %v64_v44 = vld [vmem:[%s4871_s0 + $0x170] sm:$0xff]  ;;  %v127_v45 = vmin.f32 %v63_v43, 512.0  ;;  %v65_v47 = vld [vmem:[%s4871_s0 + $0x178] sm:$0xff] }
  0x2b   :  { %2870 = vmatprep.mubr.msk.f32.mxu0 %vm155_vm1, %v102_v51  ;;  %2955 = vmatpush3.msra.mxu1 %v807_v53  ;;  %v126_v42 = vmin.f32 %v62_v40, 512.0  ;;  %v128_v46 = vmin.f32 %v64_v44, 512.0  ;;  %v66_v48 = vld [vmem:[%s4871_s0 + $0x180] sm:$0xff]  ;;  %v129_v49 = vmin.f32 %v65_v47, 512.0  ;;  %v67_v51 = vld [vmem:[%s4871_s0 + $0x188] sm:$0xff]  ;;  %v68_v52 = vld [vmem:[%s4871_s0 + $0x190] sm:$0xff] }
  0x2c   :  { %2956 = vmatprep.subr.mxu1 %v806_v55  ;;  %v130_v50 = vmin.f32 %v66_v48, 512.0  ;;  %v131_v53 = vmin.f32 %v67_v51, 512.0  ;;  %v132_v54 = vmin.f32 %v68_v52, 512.0  ;;  %v72_v60 = vld [vmem:[%s4871_s0 + $0x1b0] sm:$0xff]  ;;  %v73_v63 = vld [vmem:[%s4871_s0 + $0x1b8] sm:$0xff]  ;;  %v74_v0 = vld [vmem:[%s4871_s0 + $0x1c0] sm:$0xff] }
  0x2d   :  { %2957 = vmatpush3.msra.mxu1 %v806_v55  ;;  %v69_v55 = vld [vmem:[%s4871_s0 + $0x198] sm:$0xff]  ;;  %v75_v3 = vld [vmem:[%s4871_s0 + $0x1c8] sm:$0xff]  ;;  %v76_v4 = vld [vmem:[%s4871_s0 + $0x1d0] sm:$0xff] }
  0x2e   :  { %2871 = vmatmul.mubr.msk.f32.gmra.mxu0 %vm155_vm1, %v103_v56  ;;  %2958 = vmatprep.subr.mxu1 %v805_v59  ;;  %v70_v56 = vld [vmem:[%s4871_s0 + $0x1a0] sm:$0xff]  ;;  %v77_v7 = vld [vmem:[%s4871_s0 + $0x1d8] sm:$0xff]  ;;  %v79_v11 = vld [vmem:[%s4871_s0 + $0x1e8] sm:$0xff] }
  0x2f   :  { %2873 = vmatprep.mubr.msk.f32.mxu0 %vm155_vm1, %v104_v57  ;;  %2959 = vmatpush3.msra.mxu1 %v805_v59  ;;  %v133_v57 = vmin.f32 %v69_v55, 512.0  ;;  %v134_v58 = vmin.f32 %v70_v56, 512.0  ;;  %v71_v59 = vld [vmem:[%s4871_s0 + $0x1a8] sm:$0xff]  ;;  %v78_v8 = vld [vmem:[%s4871_s0 + $0x1e0] sm:$0xff]  ;;  %v80_v12 = vld [vmem:[%s4871_s0 + $0x1f0] sm:$0xff] }
  0x30   :  { %2960 = vmatprep.subr.mxu1 %v804_v21  ;;  %v81_v15 = vld [vmem:[%s4871_s0 + $0x1f8] sm:$0xff]  ;;  %v3858_v19 = vld [vmem:[%s4874_s3 + $0x68] sm:$0xff]  ;;  %v3865_v20 = vld [vmem:[%s4874_s3 + $0x60] sm:$0xff] }
  0x31   :  { %2961 = vmatpush3.msra.mxu1 %v804_v21  ;;  %v145_v16 = vmin.f32 %v81_v15, 512.0  ;;  %v3872_v21 = vld [vmem:[%s4874_s3 + $0x58] sm:$0xff]  ;;  %v3891_v24 = vld [vmem:[%s4874_s3 + $0x48] sm:$0xff]  ;;  %v3900_v30 = vld [vmem:[%s4874_s3 + $0x40] sm:$0xff] }
  0x32   :  { %2874 = vmatmul.mubr.msk.f32.gmra.mxu0 %vm155_vm1, %v105_v61  ;;  %2962 = vmatprep.subr.mxu1 %v803_v25  ;;  %v135_v61 = vmin.f32 %v71_v59, 512.0  ;;  %v3913_v36 = vld [vmem:[%s4874_s3 + $0x30] sm:$0xff]  ;;  %v3921_v39 = vld [vmem:[%s4874_s3 + $0x28] sm:$0xff]  ;;  %v3930_v44 = vld [vmem:[%s4874_s3 + $0x20] sm:$0xff] }
  0x33   :  { %2876 = vmatprep.mubr.msk.f32.mxu0 %vm155_vm1, %v106_v62  ;;  %2963 = vmatpush3.msra.mxu1 %v803_v25  ;;  %v136_v62 = vmin.f32 %v72_v60, 512.0  ;;  %v3939_v47 = vld [vmem:[%s4874_s3 + $0x18] sm:$0xff]  ;;  %v3948_v52 = vld [vmem:[%s4874_s3 + $0x10] sm:$0xff]  ;;  %v3957_v55 = vld [vmem:[%s4874_s3 + $0x8] sm:$0xff] }
  0x34   :  { %2964 = vmatprep.subr.mxu1 %v802_v27  ;;  %v3966_v60 = vld [vmem:[%s4874_s3] sm:$0xff] }
  0x35   :  { %2965 = vmatpush3.msra.mxu1 %v802_v27 }
  0x36   :  { %2877 = vmatmul.mubr.msk.f32.gmra.mxu0 %vm155_vm1, %v107_v1  ;;  %2966 = vmatprep.subr.mxu1 %v801_v31  ;;  %v137_v1 = vmin.f32 %v73_v63, 512.0 }
  0x37   :  { %2879 = vmatprep.mubr.msk.f32.mxu0 %vm155_vm1, %v108_v2  ;;  %2967 = vmatpush3.msra.mxu1 %v801_v31  ;;  %v138_v2 = vmin.f32 %v74_v0, 512.0  ;;  %v3905_v31 = vld [vmem:[%s4874_s3 + $0x38] sm:$0xff] }
  0x3a   :  { %2880 = vmatmul.mubr.msk.f32.gmra.mxu0 %vm155_vm1, %v109_v5  ;;  %v139_v5 = vmin.f32 %v75_v3, 512.0 }
  0x3b   :  { %2882 = vmatprep.mubr.msk.f32.mxu0 %vm155_vm1, %v110_v6  ;;  %v140_v6 = vmin.f32 %v76_v4, 512.0 }
  0x3e   :  { %2883 = vmatmul.mubr.msk.f32.gmra.mxu0 %vm155_vm1, %v111_v9  ;;  %v141_v9 = vmin.f32 %v77_v7, 512.0 }
  0x3f   :  { %2885 = vmatprep.mubr.msk.f32.mxu0 %vm155_vm1, %v112_v10  ;;  %v142_v10 = vmin.f32 %v78_v8, 512.0 }
  0x42   :  { %2886 = vmatmul.mubr.msk.f32.gmra.mxu0 %vm155_vm1, %v113_v13  ;;  %v143_v13 = vmin.f32 %v79_v11, 512.0 }
  0x43   :  { %2888 = vmatprep.mubr.msk.f32.mxu0 %vm155_vm1, %v114_v14  ;;  %v144_v14 = vmin.f32 %v80_v12, 512.0 }
  0x46   :  { %2889 = vmatmul.mubr.msk.f32.gmra.mxu0 %vm155_vm1, %v115_v17  ;;  %v3843_v17 = vld [vmem:[%s4874_s3 + $0x78] sm:$0xff] }
  0x47   :  { %2891 = vmatprep.mubr.msk.f32.mxu0 %vm155_vm1, %v116_v18  ;;  %3064 = vmatprep.subr.mxu0 %v3843_v17  ;;  %v3851_v18 = vld [vmem:[%s4874_s3 + $0x70] sm:$0xff] }
  0x48   :  { %3320 = vmatprep.subr.mxu1 %v3843_v17  ;;  %3065 = vmatpush3.msra.mxu0 %v3843_v17 }
  0x49   :  { %3066 = vmatprep.subr.mxu0 %v3851_v18 }
  0x4a   :  { %2892 = vmatmul.mubr.msk.f32.gmra.mxu0 %vm155_vm1, %v117_v22  ;;  %v3879_v22 = vld [vmem:[%s4874_s3 + $0x50] sm:$0xff] }
  0x4b   :  { %2894 = vmatprep.mubr.msk.f32.mxu0 %vm155_vm1, %v118_v23  ;;  %3067 = vmatpush3.msra.mxu0 %v3851_v18  ;;  %v3886_v23 = vld [vmem:[%s4872_s1] ss:$0 sm:$0xff] }
  0x4c   :  { %3068 = vmatprep.subr.mxu0 %v3858_v19 }
  0x4d   :  { %3069 = vmatpush3.msra.mxu0 %v3858_v19 }
  0x4e   :  { %2895 = vmatmul.mubr.msk.f32.gmra.mxu0 %vm155_vm1, %v119_v28  ;;  %3070 = vmatprep.subr.mxu0 %v3865_v20 }
  0x4f   :  { %2897 = vmatprep.mubr.msk.f32.mxu0 %vm155_vm1, %v120_v29  ;;  %3071 = vmatpush3.msra.mxu0 %v3865_v20 }
  0x50   :  { %3072 = vmatprep.subr.mxu0 %v3872_v21 }
  0x51   :  { %3073 = vmatpush3.msra.mxu0 %v3872_v21 }
  0x52   :  { %2898 = vmatmul.mubr.msk.f32.gmra.mxu0 %vm155_vm1, %v121_v33  ;;  %3074 = vmatprep.subr.mxu0 %v3879_v22 }
  0x53   :  { %2900 = vmatprep.mubr.msk.f32.mxu0 %vm155_vm1, %v122_v34  ;;  %3075 = vmatpush3.msra.mxu0 %v3879_v22 }
  0x54   :  { %3076 = vmatprep.subr.mxu0 %v3891_v24 }
  0x55   :  { %3077 = vmatpush3.msra.mxu0 %v3891_v24 }
  0x56   :  { %2901 = vmatmul.mubr.msk.f32.gmra.mxu0 %vm155_vm1, %v123_v37  ;;  %3078 = vmatprep.subr.mxu0 %v3900_v30 }
  0x57   :  { %2903 = vmatprep.mubr.msk.f32.mxu0 %vm155_vm1, %v124_v38  ;;  %3079 = vmatpush3.msra.mxu0 %v3900_v30 }
  0x58   :  { %3080 = vmatprep.subr.mxu0 %v3905_v31 }
  0x59   :  { %3081 = vmatpush3.msra.mxu0 %v3905_v31 }
  0x5a   :  { %2904 = vmatmul.mubr.msk.f32.gmra.mxu0 %vm155_vm1, %v125_v41  ;;  %3082 = vmatprep.subr.mxu0 %v3913_v36 }
  0x5b   :  { %2906 = vmatprep.mubr.msk.f32.mxu0 %vm155_vm1, %v126_v42  ;;  %3083 = vmatpush3.msra.mxu0 %v3913_v36 }
  0x5c   :  { %3084 = vmatprep.subr.mxu0 %v3921_v39 }
  0x5d   :  { %3085 = vmatpush3.msra.mxu0 %v3921_v39 }
  0x5e   :  { %2907 = vmatmul.mubr.msk.f32.gmra.mxu0 %vm155_vm1, %v127_v45  ;;  %3086 = vmatprep.subr.mxu0 %v3930_v44 }
  0x5f   :  { %2909 = vmatprep.mubr.msk.f32.mxu0 %vm155_vm1, %v128_v46  ;;  %3087 = vmatpush3.msra.mxu0 %v3930_v44 }
  0x60   :  { %3088 = vmatprep.subr.mxu0 %v3939_v47 }
  0x61   :  { %3089 = vmatpush3.msra.mxu0 %v3939_v47 }
  0x62   :  { %2910 = vmatmul.mubr.msk.f32.gmra.mxu0 %vm155_vm1, %v129_v49  ;;  %3090 = vmatprep.subr.mxu0 %v3948_v52 }
  0x63   :  { %2912 = vmatprep.mubr.msk.f32.mxu0 %vm155_vm1, %v130_v50  ;;  %3091 = vmatpush3.msra.mxu0 %v3948_v52 }
  0x64   :  { %3092 = vmatprep.subr.mxu0 %v3957_v55 }
  0x65   :  { %3093 = vmatpush3.msra.mxu0 %v3957_v55 }
  0x66   :  { %2913 = vmatmul.mubr.msk.f32.gmra.mxu0 %vm155_vm1, %v131_v53  ;;  %3094 = vmatprep.subr.mxu0 %v3966_v60 }
  0x67   :  { %2915 = vmatprep.mubr.msk.f32.mxu0 %vm155_vm1, %v132_v54  ;;  %3095 = vmatpush3.msra.mxu0 %v3966_v60 }
  0x68   :  { %3192 = vmatprep.subr.mxu0 %v3843_v17 }
  0x6a   :  { %2916 = vmatmul.mubr.msk.f32.gmra.mxu0 %vm155_vm1, %v133_v57 }
  0x6b   :  { %2918 = vmatprep.mubr.msk.f32.mxu0 %vm155_vm1, %v134_v58 }
  0x6e   :  { %2919 = vmatmul.mubr.msk.f32.gmra.mxu0 %vm155_vm1, %v135_v61 }
  0x6f   :  { %2921 = vmatprep.mubr.msk.f32.mxu0 %vm155_vm1, %v136_v62 }
  0x72   :  { %2922 = vmatmul.mubr.msk.f32.gmra.mxu0 %vm155_vm1, %v137_v1 }
  0x73   :  { %2924 = vmatprep.mubr.msk.f32.mxu0 %vm155_vm1, %v138_v2 }
  0x76   :  { %2925 = vmatmul.mubr.msk.f32.gmra.mxu0 %vm155_vm1, %v139_v5 }
  0x77   :  { %2927 = vmatprep.mubr.msk.f32.mxu0 %vm155_vm1, %v140_v6 }
  0x7a   :  { %2928 = vmatmul.mubr.msk.f32.gmra.mxu0 %vm155_vm1, %v141_v9 }
  0x7b   :  { %2930 = vmatprep.mubr.msk.f32.mxu0 %vm155_vm1, %v142_v10 }
  0x7e   :  { %2931 = vmatmul.mubr.msk.f32.gmra.mxu0 %vm155_vm1, %v143_v13 }
  0x7f   :  { %2933 = vmatprep.mubr.msk.f32.mxu0 %vm155_vm1, %v144_v14 }
  0x82   :  { %2934 = vmatmul.mubr.msk.f32.gmra.mxu0 %vm155_vm1, %v145_v16 }
  0xc6   :  { %v2842_v25 = vpop.f32.mrf.mxu0 }
  0xc7   :  { %v424_v26 = vadd.f32 %v2842_v25, %v3886_v23 }
  0xc8   :  { %v418_v27 = vpop.f32.mrf.mxu0 }
  0xc9   :  { %v419_v28 = vadd.f32 %v3886_v23, %v418_v27  ;;  %v738_v33 = vmax.f32 %v424_v26, 0.0 }
  0xca   :  { %v2845_v29 = vpop.f32.mrf.mxu0 }
  0xcb   :  { %v737_v32 = vmax.f32 %v419_v28, 0.0  ;;  %v434_v34 = vadd.f32 %v2845_v29, %v3886_v23 }
  0xcc   :  { %v428_v35 = vpop.f32.mrf.mxu0 }
  0xcd   :  { %v429_v37 = vadd.f32 %v3886_v23, %v428_v35  ;;  %2968 = vmatprep.mubr.f32.mxu1 %v737_v32  ;;  %v740_v41 = vmax.f32 %v434_v34, 0.0 }
  0xce   :  { %v2848_v38 = vpop.f32.mrf.mxu0  ;;  %2969 = vmatmul.mubr.f32.vlgmr.msra.gmra.mxu1 %v738_v33 }
  0xcf   :  { %v739_v40 = vmax.f32 %v429_v37, 0.0  ;;  %3336 = vmatpush3.msra.mxu1 %v3843_v17  ;;  %v444_v42 = vadd.f32 %v2848_v38, %v3886_v23 }
  0xd0   :  { %v438_v43 = vpop.f32.mrf.mxu0  ;;  %3321 = vmatprep.subr.mxu1 %v3851_v18 }
  0xd1   :  { %v439_v45 = vadd.f32 %v3886_v23, %v438_v43  ;;  %2971 = vmatprep.mubr.f32.mxu1 %v739_v40  ;;  %3337 = vmatpush3.msra.mxu1 %v3851_v18  ;;  %v742_v49 = vmax.f32 %v444_v42, 0.0 }
  0xd2   :  { %v2851_v46 = vpop.f32.mrf.mxu0  ;;  %2972 = vmatmul.mubr.f32.gmra.mxu1 %v740_v41  ;;  %3322 = vmatprep.subr.mxu1 %v3858_v19 }
  0xd3   :  { %v741_v48 = vmax.f32 %v439_v45, 0.0  ;;  %v454_v50 = vadd.f32 %v2851_v46, %v3886_v23  ;;  %3338 = vmatpush3.msra.mxu1 %v3858_v19 }
  0xd4   :  { %v448_v51 = vpop.f32.mrf.mxu0  ;;  %3323 = vmatprep.subr.mxu1 %v3865_v20 }
  0xd5   :  { %v449_v53 = vadd.f32 %v3886_v23, %v448_v51  ;;  %2974 = vmatprep.mubr.f32.mxu1 %v741_v48  ;;  %v744_v57 = vmax.f32 %v454_v50, 0.0  ;;  %3339 = vmatpush3.msra.mxu1 %v3865_v20 }
  0xd6   :  { %v2854_v54 = vpop.f32.mrf.mxu0  ;;  %2975 = vmatmul.mubr.f32.gmra.mxu1 %v742_v49  ;;  %3324 = vmatprep.subr.mxu1 %v3872_v21 }
  0xd7   :  { %v743_v56 = vmax.f32 %v449_v53, 0.0  ;;  %v464_v58 = vadd.f32 %v2854_v54, %v3886_v23  ;;  %3340 = vmatpush3.msra.mxu1 %v3872_v21 }
  0xd8   :  { %v458_v59 = vpop.f32.mrf.mxu0  ;;  %3325 = vmatprep.subr.mxu1 %v3879_v22 }
  0xd9   :  { %v459_v61 = vadd.f32 %v3886_v23, %v458_v59  ;;  %2977 = vmatprep.mubr.f32.mxu1 %v743_v56  ;;  %v746_v0 = vmax.f32 %v464_v58, 0.0  ;;  %3341 = vmatpush3.msra.mxu1 %v3879_v22 }
  0xda   :  { %v2857_v62 = vpop.f32.mrf.mxu0  ;;  %2978 = vmatmul.mubr.f32.gmra.mxu1 %v744_v57  ;;  %3326 = vmatprep.subr.mxu1 %v3891_v24 }
  0xdb   :  { %v745_v63 = vmax.f32 %v459_v61, 0.0  ;;  %v474_v1 = vadd.f32 %v2857_v62, %v3886_v23  ;;  %3342 = vmatpush3.msra.mxu1 %v3891_v24 }
  0xdc   :  { %v468_v2 = vpop.f32.mrf.mxu0  ;;  %3327 = vmatprep.subr.mxu1 %v3900_v30 }
  0xdd   :  { %v469_v3 = vadd.f32 %v3886_v23, %v468_v2  ;;  %2980 = vmatprep.mubr.f32.mxu1 %v745_v63  ;;  %v748_v6 = vmax.f32 %v474_v1, 0.0  ;;  %3343 = vmatpush3.msra.mxu1 %v3900_v30 }
  0xde   :  { %v2860_v4 = vpop.f32.mrf.mxu0  ;;  %2981 = vmatmul.mubr.f32.gmra.mxu1 %v746_v0  ;;  %3328 = vmatprep.subr.mxu1 %v3905_v31 }
  0xdf   :  { %v747_v5 = vmax.f32 %v469_v3, 0.0  ;;  %v484_v7 = vadd.f32 %v2860_v4, %v3886_v23  ;;  %3344 = vmatpush3.msra.mxu1 %v3905_v31 }
  0xe0   :  { %v478_v8 = vpop.f32.mrf.mxu0  ;;  %3329 = vmatprep.subr.mxu1 %v3913_v36 }
  0xe1   :  { %v479_v9 = vadd.f32 %v3886_v23, %v478_v8  ;;  %2983 = vmatprep.mubr.f32.mxu1 %v747_v5  ;;  %v750_v12 = vmax.f32 %v484_v7, 0.0  ;;  %3345 = vmatpush3.msra.mxu1 %v3913_v36 }
  0xe2   :  { %v2863_v10 = vpop.f32.mrf.mxu0  ;;  %2984 = vmatmul.mubr.f32.gmra.mxu1 %v748_v6  ;;  %3330 = vmatprep.subr.mxu1 %v3921_v39 }
  0xe3   :  { %v749_v11 = vmax.f32 %v479_v9, 0.0  ;;  %v494_v13 = vadd.f32 %v2863_v10, %v3886_v23  ;;  %3346 = vmatpush3.msra.mxu1 %v3921_v39 }
  0xe4   :  { %v488_v14 = vpop.f32.mrf.mxu0  ;;  %3331 = vmatprep.subr.mxu1 %v3930_v44 }
  0xe5   :  { %v489_v15 = vadd.f32 %v3886_v23, %v488_v14  ;;  %2986 = vmatprep.mubr.f32.mxu1 %v749_v11  ;;  %v752_v26 = vmax.f32 %v494_v13, 0.0  ;;  %3347 = vmatpush3.msra.mxu1 %v3930_v44 }
  0xe6   :  { %v2866_v16 = vpop.f32.mrf.mxu0  ;;  %2987 = vmatmul.mubr.f32.gmra.mxu1 %v750_v12  ;;  %3332 = vmatprep.subr.mxu1 %v3939_v47 }
  0xe7   :  { %v751_v25 = vmax.f32 %v489_v15, 0.0  ;;  %v504_v27 = vadd.f32 %v2866_v16, %v3886_v23  ;;  %3348 = vmatpush3.msra.mxu1 %v3939_v47 }
  0xe8   :  { %v498_v28 = vpop.f32.mrf.mxu0  ;;  %3333 = vmatprep.subr.mxu1 %v3948_v52 }
  0xe9   :  { %v499_v29 = vadd.f32 %v3886_v23, %v498_v28  ;;  %2989 = vmatprep.mubr.f32.mxu1 %v751_v25  ;;  %v754_v34 = vmax.f32 %v504_v27, 0.0  ;;  %3349 = vmatpush3.msra.mxu1 %v3948_v52 }
  0xea   :  { %v2869_v32 = vpop.f32.mrf.mxu0  ;;  %2990 = vmatmul.mubr.f32.gmra.mxu1 %v752_v26  ;;  %3334 = vmatprep.subr.mxu1 %v3957_v55 }
  0xeb   :  { %v753_v33 = vmax.f32 %v499_v29, 0.0  ;;  %v514_v35 = vadd.f32 %v2869_v32, %v3886_v23  ;;  %3350 = vmatpush3.msra.mxu1 %v3957_v55 }
  0xec   :  { %v508_v37 = vpop.f32.mrf.mxu0  ;;  %3335 = vmatprep.subr.mxu1 %v3966_v60 }
  0xed   :  { %v509_v38 = vadd.f32 %v3886_v23, %v508_v37  ;;  %2992 = vmatprep.mubr.f32.mxu1 %v753_v33  ;;  %v756_v42 = vmax.f32 %v514_v35, 0.0  ;;  %3351 = vmatpush3.msra.mxu1 %v3966_v60 }
  0xee   :  { %v2872_v40 = vpop.f32.mrf.mxu0  ;;  %2993 = vmatmul.mubr.f32.gmra.mxu1 %v754_v34 }
  0xef   :  { %v755_v41 = vmax.f32 %v509_v38, 0.0  ;;  %v524_v43 = vadd.f32 %v2872_v40, %v3886_v23 }
  0xf0   :  { %v518_v45 = vpop.f32.mrf.mxu0 }
  0xf1   :  { %v519_v46 = vadd.f32 %v3886_v23, %v518_v45  ;;  %2995 = vmatprep.mubr.f32.mxu1 %v755_v41  ;;  %v758_v50 = vmax.f32 %v524_v43, 0.0 }
  0xf2   :  { %v2875_v48 = vpop.f32.mrf.mxu0  ;;  %2996 = vmatmul.mubr.f32.gmra.mxu1 %v756_v42 }
  0xf3   :  { %v757_v49 = vmax.f32 %v519_v46, 0.0  ;;  %v534_v51 = vadd.f32 %v2875_v48, %v3886_v23 }
  0xf4   :  { %v528_v53 = vpop.f32.mrf.mxu0 }
  0xf5   :  { %v529_v54 = vadd.f32 %v3886_v23, %v528_v53  ;;  %2998 = vmatprep.mubr.f32.mxu1 %v757_v49  ;;  %v760_v58 = vmax.f32 %v534_v51, 0.0 }
  0xf6   :  { %v2878_v56 = vpop.f32.mrf.mxu0  ;;  %2999 = vmatmul.mubr.f32.gmra.mxu1 %v758_v50 }
  0xf7   :  { %v759_v57 = vmax.f32 %v529_v54, 0.0  ;;  %v544_v59 = vadd.f32 %v2878_v56, %v3886_v23 }
  0xf8   :  { %v538_v61 = vpop.f32.mrf.mxu0 }
  0xf9   :  { %v539_v62 = vadd.f32 %v3886_v23, %v538_v61  ;;  %3001 = vmatprep.mubr.f32.mxu1 %v759_v57  ;;  %v762_v1 = vmax.f32 %v544_v59, 0.0 }
  0xfa   :  { %v2881_v63 = vpop.f32.mrf.mxu0  ;;  %3002 = vmatmul.mubr.f32.gmra.mxu1 %v760_v58 }
  0xfb   :  { %v761_v0 = vmax.f32 %v539_v62, 0.0  ;;  %v554_v2 = vadd.f32 %v2881_v63, %v3886_v23 }
  0xfc   :  { %v548_v3 = vpop.f32.mrf.mxu0 }
  0xfd   :  { %v549_v4 = vadd.f32 %v3886_v23, %v548_v3  ;;  %3004 = vmatprep.mubr.f32.mxu1 %v761_v0  ;;  %v764_v7 = vmax.f32 %v554_v2, 0.0 }
  0xfe   :  { %v2884_v5 = vpop.f32.mrf.mxu0  ;;  %3005 = vmatmul.mubr.f32.gmra.mxu1 %v762_v1 }
  0xff   :  { %v763_v6 = vmax.f32 %v549_v4, 0.0  ;;  %v564_v8 = vadd.f32 %v2884_v5, %v3886_v23 }
 0x100   :  { %v558_v9 = vpop.f32.mrf.mxu0 }
 0x101   :  { %v559_v10 = vadd.f32 %v3886_v23, %v558_v9  ;;  %3007 = vmatprep.mubr.f32.mxu1 %v763_v6  ;;  %v766_v13 = vmax.f32 %v564_v8, 0.0 }
 0x102   :  { %v2887_v11 = vpop.f32.mrf.mxu0  ;;  %3008 = vmatmul.mubr.f32.gmra.mxu1 %v764_v7 }
 0x103   :  { %v765_v12 = vmax.f32 %v559_v10, 0.0  ;;  %v574_v14 = vadd.f32 %v2887_v11, %v3886_v23 }
 0x104   :  { %v568_v15 = vpop.f32.mrf.mxu0 }
 0x105   :  { %v569_v16 = vadd.f32 %v3886_v23, %v568_v15  ;;  %3010 = vmatprep.mubr.f32.mxu1 %v765_v12  ;;  %v768_v27 = vmax.f32 %v574_v14, 0.0 }
 0x106   :  { %v2890_v25 = vpop.f32.mrf.mxu0  ;;  %3011 = vmatmul.mubr.f32.gmra.mxu1 %v766_v13 }
 0x107   :  { %v767_v26 = vmax.f32 %v569_v16, 0.0  ;;  %v584_v28 = vadd.f32 %v2890_v25, %v3886_v23 }
 0x108   :  { %v578_v29 = vpop.f32.mrf.mxu0 }
 0x109   :  { %v579_v32 = vadd.f32 %v3886_v23, %v578_v29  ;;  %3013 = vmatprep.mubr.f32.mxu1 %v767_v26  ;;  %v770_v35 = vmax.f32 %v584_v28, 0.0 }
 0x10a   :  { %v2893_v33 = vpop.f32.mrf.mxu0  ;;  %3014 = vmatmul.mubr.f32.gmra.mxu1 %v768_v27 }
 0x10b   :  { %v769_v34 = vmax.f32 %v579_v32, 0.0  ;;  %v594_v37 = vadd.f32 %v2893_v33, %v3886_v23 }
 0x10c   :  { %v588_v38 = vpop.f32.mrf.mxu0 }
 0x10d   :  { %v589_v40 = vadd.f32 %v3886_v23, %v588_v38  ;;  %3016 = vmatprep.mubr.f32.mxu1 %v769_v34  ;;  %v772_v43 = vmax.f32 %v594_v37, 0.0 }
 0x10e   :  { %v2896_v41 = vpop.f32.mrf.mxu0  ;;  %3017 = vmatmul.mubr.f32.gmra.mxu1 %v770_v35 }
 0x10f   :  { %v771_v42 = vmax.f32 %v589_v40, 0.0  ;;  %v604_v45 = vadd.f32 %v2896_v41, %v3886_v23 }
 0x110   :  { %v598_v46 = vpop.f32.mrf.mxu0 }
 0x111   :  { %v599_v48 = vadd.f32 %v3886_v23, %v598_v46  ;;  %3019 = vmatprep.mubr.f32.mxu1 %v771_v42  ;;  %v774_v51 = vmax.f32 %v604_v45, 0.0 }
 0x112   :  { %v2899_v49 = vpop.f32.mrf.mxu0  ;;  %3020 = vmatmul.mubr.f32.gmra.mxu1 %v772_v43 }
 0x113   :  { %v773_v50 = vmax.f32 %v599_v48, 0.0  ;;  %v614_v53 = vadd.f32 %v2899_v49, %v3886_v23 }
 0x114   :  { %v608_v54 = vpop.f32.mrf.mxu0 }
 0x115   :  { %v609_v56 = vadd.f32 %v3886_v23, %v608_v54  ;;  %3022 = vmatprep.mubr.f32.mxu1 %v773_v50  ;;  %v776_v59 = vmax.f32 %v614_v53, 0.0 }
 0x116   :  { %v2902_v57 = vpop.f32.mrf.mxu0  ;;  %3023 = vmatmul.mubr.f32.gmra.mxu1 %v774_v51 }
 0x117   :  { %v775_v58 = vmax.f32 %v609_v56, 0.0  ;;  %v624_v61 = vadd.f32 %v2902_v57, %v3886_v23 }
 0x118   :  { %v618_v62 = vpop.f32.mrf.mxu0 }
 0x119   :  { %v619_v63 = vadd.f32 %v3886_v23, %v618_v62  ;;  %3025 = vmatprep.mubr.f32.mxu1 %v775_v58  ;;  %v778_v2 = vmax.f32 %v624_v61, 0.0 }
 0x11a   :  { %v2905_v0 = vpop.f32.mrf.mxu0  ;;  %3026 = vmatmul.mubr.f32.gmra.mxu1 %v776_v59 }
 0x11b   :  { %v777_v1 = vmax.f32 %v619_v63, 0.0  ;;  %v634_v3 = vadd.f32 %v2905_v0, %v3886_v23 }
 0x11c   :  { %v628_v4 = vpop.f32.mrf.mxu0 }
 0x11d   :  { %v629_v5 = vadd.f32 %v3886_v23, %v628_v4  ;;  %3028 = vmatprep.mubr.f32.mxu1 %v777_v1  ;;  %v780_v8 = vmax.f32 %v634_v3, 0.0 }
 0x11e   :  { %v2908_v6 = vpop.f32.mrf.mxu0  ;;  %3029 = vmatmul.mubr.f32.gmra.mxu1 %v778_v2 }
 0x11f   :  { %v779_v7 = vmax.f32 %v629_v5, 0.0  ;;  %v644_v9 = vadd.f32 %v2908_v6, %v3886_v23 }
 0x120   :  { %v638_v10 = vpop.f32.mrf.mxu0 }
 0x121   :  { %v639_v11 = vadd.f32 %v3886_v23, %v638_v10  ;;  %3031 = vmatprep.mubr.f32.mxu1 %v779_v7  ;;  %v782_v14 = vmax.f32 %v644_v9, 0.0 }
 0x122   :  { %v2911_v12 = vpop.f32.mrf.mxu0  ;;  %3032 = vmatmul.mubr.f32.gmra.mxu1 %v780_v8 }
 0x123   :  { %v781_v13 = vmax.f32 %v639_v11, 0.0  ;;  %v654_v15 = vadd.f32 %v2911_v12, %v3886_v23 }
 0x124   :  { %v648_v16 = vpop.f32.mrf.mxu0 }
 0x125   :  { %v649_v25 = vadd.f32 %v3886_v23, %v648_v16  ;;  %3034 = vmatprep.mubr.f32.mxu1 %v781_v13  ;;  %v784_v28 = vmax.f32 %v654_v15, 0.0 }
 0x126   :  { %v2914_v26 = vpop.f32.mrf.mxu0  ;;  %3035 = vmatmul.mubr.f32.gmra.mxu1 %v782_v14 }
 0x127   :  { %v783_v27 = vmax.f32 %v649_v25, 0.0  ;;  %v664_v29 = vadd.f32 %v2914_v26, %v3886_v23 }
 0x128   :  { %v658_v32 = vpop.f32.mrf.mxu0 }
 0x129   :  { %v659_v33 = vadd.f32 %v3886_v23, %v658_v32  ;;  %3037 = vmatprep.mubr.f32.mxu1 %v783_v27  ;;  %v786_v37 = vmax.f32 %v664_v29, 0.0  ;;  %v4057_v32 = vld [vmem:[%s4872_s1 + $0x1] ss:$0 sm:$0xff] }
 0x12a   :  { %v2917_v34 = vpop.f32.mrf.mxu0  ;;  %3038 = vmatmul.mubr.f32.gmra.mxu1 %v784_v28 }
 0x12b   :  { %v785_v35 = vmax.f32 %v659_v33, 0.0  ;;  %v674_v38 = vadd.f32 %v2917_v34, %v3886_v23 }
 0x12c   :  { %v668_v40 = vpop.f32.mrf.mxu0 }
 0x12d   :  { %v669_v41 = vadd.f32 %v3886_v23, %v668_v40  ;;  %3040 = vmatprep.mubr.f32.mxu1 %v785_v35  ;;  %v788_v45 = vmax.f32 %v674_v38, 0.0 }
 0x12e   :  { %v2920_v42 = vpop.f32.mrf.mxu0  ;;  %3041 = vmatmul.mubr.f32.gmra.mxu1 %v786_v37 }
 0x12f   :  { %v787_v43 = vmax.f32 %v669_v41, 0.0  ;;  %v684_v46 = vadd.f32 %v2920_v42, %v3886_v23 }
 0x130   :  { %v678_v48 = vpop.f32.mrf.mxu0 }
 0x131   :  { %v679_v49 = vadd.f32 %v3886_v23, %v678_v48  ;;  %3043 = vmatprep.mubr.f32.mxu1 %v787_v43  ;;  %v790_v53 = vmax.f32 %v684_v46, 0.0 }
 0x132   :  { %v2923_v50 = vpop.f32.mrf.mxu0  ;;  %3044 = vmatmul.mubr.f32.gmra.mxu1 %v788_v45 }
 0x133   :  { %v789_v51 = vmax.f32 %v679_v49, 0.0  ;;  %v694_v54 = vadd.f32 %v2923_v50, %v3886_v23 }
 0x134   :  { %v688_v56 = vpop.f32.mrf.mxu0 }
 0x135   :  { %v689_v57 = vadd.f32 %v3886_v23, %v688_v56  ;;  %3046 = vmatprep.mubr.f32.mxu1 %v789_v51  ;;  %v792_v61 = vmax.f32 %v694_v54, 0.0 }
 0x136   :  { %v2926_v58 = vpop.f32.mrf.mxu0  ;;  %3047 = vmatmul.mubr.f32.gmra.mxu1 %v790_v53 }
 0x137   :  { %v791_v59 = vmax.f32 %v689_v57, 0.0  ;;  %v704_v62 = vadd.f32 %v2926_v58, %v3886_v23 }
 0x138   :  { %v698_v63 = vpop.f32.mrf.mxu0 }
 0x139   :  { %v699_v0 = vadd.f32 %v3886_v23, %v698_v63  ;;  %3049 = vmatprep.mubr.f32.mxu1 %v791_v59  ;;  %v794_v3 = vmax.f32 %v704_v62, 0.0 }
 0x13a   :  { %v2929_v1 = vpop.f32.mrf.mxu0  ;;  %3050 = vmatmul.mubr.f32.gmra.mxu1 %v792_v61 }
 0x13b   :  { %v793_v2 = vmax.f32 %v699_v0, 0.0  ;;  %v714_v4 = vadd.f32 %v2929_v1, %v3886_v23 }
 0x13c   :  { %v708_v5 = vpop.f32.mrf.mxu0 }
 0x13d   :  { %v709_v6 = vadd.f32 %v3886_v23, %v708_v5  ;;  %3052 = vmatprep.mubr.f32.mxu1 %v793_v2  ;;  %v796_v9 = vmax.f32 %v714_v4, 0.0 }
 0x13e   :  { %v2932_v7 = vpop.f32.mrf.mxu0  ;;  %3053 = vmatmul.mubr.f32.gmra.mxu1 %v794_v3 }
 0x13f   :  { %v795_v8 = vmax.f32 %v709_v6, 0.0  ;;  %v724_v10 = vadd.f32 %v2932_v7, %v3886_v23 }
 0x140   :  { %v718_v11 = vpop.f32.mrf.mxu0 }
 0x141   :  { %v719_v12 = vadd.f32 %v3886_v23, %v718_v11  ;;  %3055 = vmatprep.mubr.f32.mxu1 %v795_v8  ;;  %v798_v15 = vmax.f32 %v724_v10, 0.0 }
 0x142   :  { %v2935_v13 = vpop.f32.mrf.mxu0  ;;  %3056 = vmatmul.mubr.f32.gmra.mxu1 %v796_v9 }
 0x143   :  { %v797_v14 = vmax.f32 %v719_v12, 0.0  ;;  %v734_v16 = vadd.f32 %v2935_v13, %v3886_v23 }
 0x144   :  { %v728_v25 = vpop.f32.mrf.mxu0 }
 0x145   :  { %v729_v26 = vadd.f32 %v3886_v23, %v728_v25  ;;  %3058 = vmatprep.mubr.f32.mxu1 %v797_v14  ;;  %v800_v28 = vmax.f32 %v734_v16, 0.0 }
 0x146   :  { %3059 = vmatmul.mubr.f32.gmra.mxu1 %v798_v15 }
 0x147   :  { %v799_v27 = vmax.f32 %v729_v26, 0.0 }
 0x149   :  { %3061 = vmatprep.mubr.f32.mxu1 %v799_v27 }
 0x14a   :  { %3062 = vmatmul.mubr.f32.gmra.mxu1 %v800_v28 }
 0x18e   :  { %v2970_v29 = vpop.f32.mrf.mxu1 }
 0x18f   :  { %v4063_v35 = vadd.f32 %v2970_v29, %v4057_v32 }
 0x190   :  { %v887_v33 = vpop.f32.mrf.mxu1 }
 0x191   :  { %v4060_v34 = vadd.f32 %v4057_v32, %v887_v33 }
 0x192   :  { %v2973_v23 = vpop.f32.mrf.mxu1 }
 0x193   :  { %3096 = vmatprep.mubr.f32.mxu0 %v4060_v34  ;;  %v4072_v40 = vadd.f32 %v2973_v23, %v4057_v32 }
 0x194   :  { %v897_v37 = vpop.f32.mrf.mxu1  ;;  %3097 = vmatmul.mubr.f32.vlgmr.msra.gmra.mxu0 %v4063_v35 }
 0x195   :  { %v4068_v38 = vadd.f32 %v4057_v32, %v897_v37  ;;  %3193 = vmatpush3.msra.mxu0 %v3843_v17 }
 0x196   :  { %v2976_v41 = vpop.f32.mrf.mxu1  ;;  %3194 = vmatprep.subr.mxu0 %v3851_v18 }
 0x197   :  { %3099 = vmatprep.mubr.f32.mxu0 %v4068_v38  ;;  %3195 = vmatpush3.msra.mxu0 %v3851_v18  ;;  %v4084_v17 = vadd.f32 %v2976_v41, %v4057_v32 }
 0x198   :  { %v907_v42 = vpop.f32.mrf.mxu1  ;;  %3100 = vmatmul.mubr.f32.gmra.mxu0 %v4072_v40  ;;  %3196 = vmatprep.subr.mxu0 %v3858_v19 }
 0x199   :  { %v4080_v43 = vadd.f32 %v4057_v32, %v907_v42  ;;  %3197 = vmatpush3.msra.mxu0 %v3858_v19 }
 0x19a   :  { %v2979_v45 = vpop.f32.mrf.mxu1  ;;  %3198 = vmatprep.subr.mxu0 %v3865_v20 }
 0x19b   :  { %3102 = vmatprep.mubr.f32.mxu0 %v4080_v43  ;;  %3199 = vmatpush3.msra.mxu0 %v3865_v20  ;;  %v4096_v19 = vadd.f32 %v2979_v45, %v4057_v32 }
 0x19c   :  { %v917_v18 = vpop.f32.mrf.mxu1  ;;  %3103 = vmatmul.mubr.f32.gmra.mxu0 %v4084_v17  ;;  %3200 = vmatprep.subr.mxu0 %v3872_v21 }
 0x19d   :  { %v4092_v46 = vadd.f32 %v4057_v32, %v917_v18  ;;  %3201 = vmatpush3.msra.mxu0 %v3872_v21 }
 0x19e   :  { %v2982_v48 = vpop.f32.mrf.mxu1  ;;  %3202 = vmatprep.subr.mxu0 %v3879_v22 }
 0x19f   :  { %3105 = vmatprep.mubr.f32.mxu0 %v4092_v46  ;;  %3203 = vmatpush3.msra.mxu0 %v3879_v22  ;;  %v4108_v21 = vadd.f32 %v2982_v48, %v4057_v32 }
 0x1a0   :  { %v927_v20 = vpop.f32.mrf.mxu1  ;;  %3106 = vmatmul.mubr.f32.gmra.mxu0 %v4096_v19  ;;  %3204 = vmatprep.subr.mxu0 %v3891_v24 }
 0x1a1   :  { %v4104_v49 = vadd.f32 %v4057_v32, %v927_v20  ;;  %3205 = vmatpush3.msra.mxu0 %v3891_v24 }
 0x1a2   :  { %v2985_v50 = vpop.f32.mrf.mxu1  ;;  %3206 = vmatprep.subr.mxu0 %v3900_v30 }
 0x1a3   :  { %3108 = vmatprep.mubr.f32.mxu0 %v4104_v49  ;;  %3207 = vmatpush3.msra.mxu0 %v3900_v30  ;;  %v4120_v24 = vadd.f32 %v2985_v50, %v4057_v32 }
 0x1a4   :  { %v937_v22 = vpop.f32.mrf.mxu1  ;;  %3109 = vmatmul.mubr.f32.gmra.mxu0 %v4108_v21  ;;  %3208 = vmatprep.subr.mxu0 %v3905_v31 }
 0x1a5   :  { %v4116_v51 = vadd.f32 %v4057_v32, %v937_v22  ;;  %3209 = vmatpush3.msra.mxu0 %v3905_v31 }
 0x1a6   :  { %v2988_v53 = vpop.f32.mrf.mxu1  ;;  %3210 = vmatprep.subr.mxu0 %v3913_v36 }
 0x1a7   :  { %3111 = vmatprep.mubr.f32.mxu0 %v4116_v51  ;;  %3211 = vmatpush3.msra.mxu0 %v3913_v36  ;;  %v4132_v31 = vadd.f32 %v2988_v53, %v4057_v32 }
 0x1a8   :  { %v947_v30 = vpop.f32.mrf.mxu1  ;;  %3112 = vmatmul.mubr.f32.gmra.mxu0 %v4120_v24  ;;  %3212 = vmatprep.subr.mxu0 %v3921_v39 }
 0x1a9   :  { %v4128_v54 = vadd.f32 %v4057_v32, %v947_v30  ;;  %3213 = vmatpush3.msra.mxu0 %v3921_v39 }
 0x1aa   :  { %v2991_v56 = vpop.f32.mrf.mxu1  ;;  %3214 = vmatprep.subr.mxu0 %v3930_v44 }
 0x1ab   :  { %3114 = vmatprep.mubr.f32.mxu0 %v4128_v54  ;;  %3215 = vmatpush3.msra.mxu0 %v3930_v44  ;;  %v4144_v39 = vadd.f32 %v2991_v56, %v4057_v32 }
 0x1ac   :  { %v957_v36 = vpop.f32.mrf.mxu1  ;;  %3115 = vmatmul.mubr.f32.gmra.mxu0 %v4132_v31  ;;  %3216 = vmatprep.subr.mxu0 %v3939_v47 }
 0x1ad   :  { %v4140_v57 = vadd.f32 %v4057_v32, %v957_v36  ;;  %3217 = vmatpush3.msra.mxu0 %v3939_v47 }
 0x1ae   :  { %v2994_v58 = vpop.f32.mrf.mxu1  ;;  %3218 = vmatprep.subr.mxu0 %v3948_v52 }
 0x1af   :  { %3117 = vmatprep.mubr.f32.mxu0 %v4140_v57  ;;  %3219 = vmatpush3.msra.mxu0 %v3948_v52  ;;  %v4156_v47 = vadd.f32 %v2994_v58, %v4057_v32 }
 0x1b0   :  { %v967_v44 = vpop.f32.mrf.mxu1  ;;  %3118 = vmatmul.mubr.f32.gmra.mxu0 %v4144_v39  ;;  %3220 = vmatprep.subr.mxu0 %v3957_v55 }
 0x1b1   :  { %v4152_v59 = vadd.f32 %v4057_v32, %v967_v44  ;;  %3221 = vmatpush3.msra.mxu0 %v3957_v55 }
 0x1b2   :  { %v2997_v61 = vpop.f32.mrf.mxu1  ;;  %3222 = vmatprep.subr.mxu0 %v3966_v60 }
 0x1b3   :  { %3120 = vmatprep.mubr.f32.mxu0 %v4152_v59  ;;  %3223 = vmatpush3.msra.mxu0 %v3966_v60  ;;  %v4166_v63 = vadd.f32 %v2997_v61, %v4057_v32 }
 0x1b4   :  { %v977_v52 = vpop.f32.mrf.mxu1  ;;  %3121 = vmatmul.mubr.f32.gmra.mxu0 %v4156_v47 }
 0x1b5   :  { %v4163_v62 = vadd.f32 %v4057_v32, %v977_v52 }
 0x1b6   :  { %v3000_v55 = vpop.f32.mrf.mxu1 }
 0x1b7   :  { %3123 = vmatprep.mubr.f32.mxu0 %v4163_v62  ;;  %v4174_v60 = vadd.f32 %v3000_v55, %v4057_v32 }
 0x1b8   :  { %v987_v0 = vpop.f32.mrf.mxu1  ;;  %3124 = vmatmul.mubr.f32.gmra.mxu0 %v4166_v63 }
 0x1b9   :  { %v4171_v1 = vadd.f32 %v4057_v32, %v987_v0 }
 0x1ba   :  { %v3003_v2 = vpop.f32.mrf.mxu1 }
 0x1bb   :  { %3126 = vmatprep.mubr.f32.mxu0 %v4171_v1  ;;  %v4182_v5 = vadd.f32 %v3003_v2, %v4057_v32 }
 0x1bc   :  { %v997_v3 = vpop.f32.mrf.mxu1  ;;  %3127 = vmatmul.mubr.f32.gmra.mxu0 %v4174_v60 }
 0x1bd   :  { %v4179_v4 = vadd.f32 %v4057_v32, %v997_v3 }
 0x1be   :  { %v3006_v6 = vpop.f32.mrf.mxu1 }
 0x1bf   :  { %3129 = vmatprep.mubr.f32.mxu0 %v4179_v4  ;;  %v4190_v9 = vadd.f32 %v3006_v6, %v4057_v32 }
 0x1c0   :  { %v1007_v7 = vpop.f32.mrf.mxu1  ;;  %3130 = vmatmul.mubr.f32.gmra.mxu0 %v4182_v5 }
 0x1c1   :  { %v4187_v8 = vadd.f32 %v4057_v32, %v1007_v7 }
 0x1c2   :  { %v3009_v10 = vpop.f32.mrf.mxu1 }
 0x1c3   :  { %3132 = vmatprep.mubr.f32.mxu0 %v4187_v8  ;;  %v4198_v13 = vadd.f32 %v3009_v10, %v4057_v32 }
 0x1c4   :  { %v1017_v11 = vpop.f32.mrf.mxu1  ;;  %3133 = vmatmul.mubr.f32.gmra.mxu0 %v4190_v9 }
 0x1c5   :  { %v4195_v12 = vadd.f32 %v4057_v32, %v1017_v11 }
 0x1c6   :  { %v3012_v14 = vpop.f32.mrf.mxu1 }
 0x1c7   :  { %3135 = vmatprep.mubr.f32.mxu0 %v4195_v12  ;;  %v4206_v25 = vadd.f32 %v3012_v14, %v4057_v32 }
 0x1c8   :  { %v1027_v15 = vpop.f32.mrf.mxu1  ;;  %3136 = vmatmul.mubr.f32.gmra.mxu0 %v4198_v13 }
 0x1c9   :  { %v4203_v16 = vadd.f32 %v4057_v32, %v1027_v15 }
 0x1ca   :  { %v3015_v26 = vpop.f32.mrf.mxu1 }
 0x1cb   :  { %3138 = vmatprep.mubr.f32.mxu0 %v4203_v16  ;;  %v4214_v29 = vadd.f32 %v3015_v26, %v4057_v32 }
 0x1cc   :  { %v1037_v27 = vpop.f32.mrf.mxu1  ;;  %3139 = vmatmul.mubr.f32.gmra.mxu0 %v4206_v25 }
 0x1cd   :  { %v4211_v28 = vadd.f32 %v4057_v32, %v1037_v27 }
 0x1ce   :  { %v3018_v33 = vpop.f32.mrf.mxu1 }
 0x1cf   :  { %3141 = vmatprep.mubr.f32.mxu0 %v4211_v28  ;;  %v4222_v41 = vadd.f32 %v3018_v33, %v4057_v32 }
 0x1d0   :  { %v1047_v23 = vpop.f32.mrf.mxu1  ;;  %3142 = vmatmul.mubr.f32.gmra.mxu0 %v4214_v29 }
 0x1d1   :  { %v4219_v37 = vadd.f32 %v4057_v32, %v1047_v23 }
 0x1d2   :  { %v3021_v42 = vpop.f32.mrf.mxu1 }
 0x1d3   :  { %3144 = vmatprep.mubr.f32.mxu0 %v4219_v37  ;;  %v4230_v48 = vadd.f32 %v3021_v42, %v4057_v32 }
 0x1d4   :  { %v1057_v45 = vpop.f32.mrf.mxu1  ;;  %3145 = vmatmul.mubr.f32.gmra.mxu0 %v4222_v41 }
 0x1d5   :  { %v4227_v18 = vadd.f32 %v4057_v32, %v1057_v45 }
 0x1d6   :  { %v3024_v20 = vpop.f32.mrf.mxu1 }
 0x1d7   :  { %3147 = vmatprep.mubr.f32.mxu0 %v4227_v18  ;;  %v4238_v53 = vadd.f32 %v3024_v20, %v4057_v32 }
 0x1d8   :  { %v1067_v50 = vpop.f32.mrf.mxu1  ;;  %3148 = vmatmul.mubr.f32.gmra.mxu0 %v4230_v48 }
 0x1d9   :  { %v4235_v22 = vadd.f32 %v4057_v32, %v1067_v50 }
 0x1da   :  { %v3027_v30 = vpop.f32.mrf.mxu1 }
 0x1db   :  { %3150 = vmatprep.mubr.f32.mxu0 %v4235_v22  ;;  %v4246_v58 = vadd.f32 %v3027_v30, %v4057_v32 }
 0x1dc   :  { %v1077_v56 = vpop.f32.mrf.mxu1  ;;  %3151 = vmatmul.mubr.f32.gmra.mxu0 %v4238_v53 }
 0x1dd   :  { %v4243_v36 = vadd.f32 %v4057_v32, %v1077_v56 }
 0x1de   :  { %v3030_v44 = vpop.f32.mrf.mxu1 }
 0x1df   :  { %3153 = vmatprep.mubr.f32.mxu0 %v4243_v36  ;;  %v4254_v55 = vadd.f32 %v3030_v44, %v4057_v32 }
 0x1e0   :  { %v1087_v61 = vpop.f32.mrf.mxu1  ;;  %3154 = vmatmul.mubr.f32.gmra.mxu0 %v4246_v58 }
 0x1e1   :  { %v4251_v52 = vadd.f32 %v4057_v32, %v1087_v61 }
 0x1e2   :  { %v3033_v0 = vpop.f32.mrf.mxu1 }
 0x1e3   :  { %3156 = vmatprep.mubr.f32.mxu0 %v4251_v52  ;;  %v4262_v6 = vadd.f32 %v3033_v0, %v4057_v32 }
 0x1e4   :  { %v1097_v2 = vpop.f32.mrf.mxu1  ;;  %3157 = vmatmul.mubr.f32.gmra.mxu0 %v4254_v55 }
 0x1e5   :  { %v4259_v3 = vadd.f32 %v4057_v32, %v1097_v2 }
 0x1e6   :  { %v3036_v7 = vpop.f32.mrf.mxu1 }
 0x1e7   :  { %3159 = vmatprep.mubr.f32.mxu0 %v4259_v3  ;;  %v4270_v14 = vadd.f32 %v3036_v7, %v4057_v32 }
 0x1e8   :  { %v1107_v10 = vpop.f32.mrf.mxu1  ;;  %3160 = vmatmul.mubr.f32.gmra.mxu0 %v4262_v6 }
 0x1e9   :  { %v4267_v11 = vadd.f32 %v4057_v32, %v1107_v10 }
 0x1ea   :  { %v3039_v15 = vpop.f32.mrf.mxu1 }
 0x1eb   :  { %3162 = vmatprep.mubr.f32.mxu0 %v4267_v11  ;;  %v4278_v33 = vadd.f32 %v3039_v15, %v4057_v32 }
 0x1ec   :  { %v1117_v26 = vpop.f32.mrf.mxu1  ;;  %3163 = vmatmul.mubr.f32.gmra.mxu0 %v4270_v14 }
 0x1ed   :  { %v4275_v27 = vadd.f32 %v4057_v32, %v1117_v26 }
 0x1ee   :  { %v3042_v23 = vpop.f32.mrf.mxu1 }
 0x1ef   :  { %3165 = vmatprep.mubr.f32.mxu0 %v4275_v27  ;;  %v4286_v20 = vadd.f32 %v3042_v23, %v4057_v32 }
 0x1f0   :  { %v1127_v42 = vpop.f32.mrf.mxu1  ;;  %3166 = vmatmul.mubr.f32.gmra.mxu0 %v4278_v33 }
 0x1f1   :  { %v4283_v45 = vadd.f32 %v4057_v32, %v1127_v42 }
 0x1f2   :  { %v3045_v50 = vpop.f32.mrf.mxu1 }
 0x1f3   :  { %3168 = vmatprep.mubr.f32.mxu0 %v4283_v45  ;;  %v4294_v44 = vadd.f32 %v3045_v50, %v4057_v32 }
 0x1f4   :  { %v1137_v30 = vpop.f32.mrf.mxu1  ;;  %3169 = vmatmul.mubr.f32.gmra.mxu0 %v4286_v20 }
 0x1f5   :  { %v4291_v56 = vadd.f32 %v4057_v32, %v1137_v30 }
 0x1f6   :  { %v3048_v61 = vpop.f32.mrf.mxu1 }
 0x1f7   :  { %3171 = vmatprep.mubr.f32.mxu0 %v4291_v56  ;;  %v4302_v7 = vadd.f32 %v3048_v61, %v4057_v32 }
 0x1f8   :  { %v1147_v0 = vpop.f32.mrf.mxu1  ;;  %3172 = vmatmul.mubr.f32.gmra.mxu0 %v4294_v44 }
 0x1f9   :  { %v4299_v2 = vadd.f32 %v4057_v32, %v1147_v0 }
 0x1fa   :  { %v3051_v10 = vpop.f32.mrf.mxu1 }
 0x1fb   :  { %4904 = vst [vmem:[#allocation5_spill] sm:$0xff] %v4299_v2  ;;  %3174 = vmatprep.mubr.f32.mxu0 %v4299_v2  ;;  %v4310_v23 = vadd.f32 %v3051_v10, %v4057_v32 }
 0x1fc   :  { %v1157_v15 = vpop.f32.mrf.mxu1  ;;  %3175 = vmatmul.mubr.f32.gmra.mxu0 %v4302_v7 }
 0x1fd   :  { %v4307_v26 = vadd.f32 %v4057_v32, %v1157_v15  ;;  %4906 = vst [vmem:[#allocation7_spill] sm:$0xff] %v4310_v23 }
 0x1fe   :  { %v3054_v42 = vpop.f32.mrf.mxu1 }
 0x1ff   :  { %4905 = vst [vmem:[#allocation6_spill] sm:$0xff] %v4307_v26  ;;  %3177 = vmatprep.mubr.f32.mxu0 %v4307_v26  ;;  %v4318_v61 = vadd.f32 %v3054_v42, %v4057_v32 }
 0x200   :  { %v1167_v50 = vpop.f32.mrf.mxu1  ;;  %3178 = vmatmul.mubr.f32.gmra.mxu0 %v4310_v23 }
 0x201   :  { %v4315_v30 = vadd.f32 %v4057_v32, %v1167_v50  ;;  %4908 = vst [vmem:[#allocation9_spill] sm:$0xff] %v4318_v61 }
 0x202   :  { %v3057_v0 = vpop.f32.mrf.mxu1 }
 0x203   :  { %4907 = vst [vmem:[#allocation8_spill] sm:$0xff] %v4315_v30  ;;  %3180 = vmatprep.mubr.f32.mxu0 %v4315_v30  ;;  %v4326_v26 = vadd.f32 %v3057_v0, %v4057_v32 }
 0x204   :  { %v1177_v15 = vpop.f32.mrf.mxu1  ;;  %3181 = vmatmul.mubr.f32.gmra.mxu0 %v4318_v61 }
 0x205   :  { %v4323_v10 = vadd.f32 %v4057_v32, %v1177_v15  ;;  %4910 = vst [vmem:[#allocation11_spill] sm:$0xff] %v4326_v26 }
 0x206   :  { %v3060_v2 = vpop.f32.mrf.mxu1 }
 0x207   :  { %4909 = vst [vmem:[#allocation10_spill] sm:$0xff] %v4323_v10  ;;  %3183 = vmatprep.mubr.f32.mxu0 %v4323_v10  ;;  %v4334_v30 = vadd.f32 %v3060_v2, %v4057_v32 }
 0x208   :  { %v1187_v50 = vpop.f32.mrf.mxu1  ;;  %3184 = vmatmul.mubr.f32.gmra.mxu0 %v4326_v26 }
 0x209   :  { %v4331_v42 = vadd.f32 %v4057_v32, %v1187_v50 }
 0x20a   :  { %v3063_v23 = vpop.f32.mrf.mxu1 }
 0x20b   :  { %4911 = vst [vmem:[#allocation12_spill] sm:$0xff] %v4331_v42  ;;  %3186 = vmatprep.mubr.f32.mxu0 %v4331_v42  ;;  %v4342_v10 = vadd.f32 %v3063_v23, %v4057_v32 }
 0x20c   :  { %v1197_v15 = vpop.f32.mrf.mxu1  ;;  %3187 = vmatmul.mubr.f32.gmra.mxu0 %v4334_v30 }
 0x20d   :  { %v4339_v0 = vadd.f32 %v4057_v32, %v1197_v15  ;;  %4913 = vst [vmem:[#allocation14_spill] sm:$0xff] %v4342_v10 }
 0x20f   :  { %4912 = vst [vmem:[#allocation13_spill] sm:$0xff] %v4339_v0  ;;  %3189 = vmatprep.mubr.f32.mxu0 %v4339_v0 }
 0x210   :  { %3190 = vmatmul.mubr.f32.gmra.mxu0 %v4342_v10 }
 0x254   :  { %v3098_v50 = vpop.f32.mrf.mxu0 }
 0x255   :  { %v4347_v2 = vsub.f32 %v4063_v35, %v3098_v50 }
 0x256   :  { %v1288_v26 = vpop.f32.mrf.mxu0 }
 0x257   :  { %v4350_v42 = vsub.f32 %v4060_v34, %v1288_v26  ;;  %v1672_v32 = vmul.f32 %v4347_v2, %v4347_v2 }
 0x258   :  { %v3101_v61 = vpop.f32.mrf.mxu0 }
 0x259   :  { %4914 = vst [vmem:[#allocation15_spill] sm:$0xff] %v4350_v42  ;;  %v1671_v15 = vmul.f32 %v4350_v42, %v4350_v42  ;;  %v4357_v23 = vsub.f32 %v4072_v40, %v3101_v61 }
 0x25a   :  { %v1298_v0 = vpop.f32.mrf.mxu0 }
 0x25b   :  { %v4360_v10 = vsub.f32 %v4068_v38, %v1298_v0  ;;  %3224 = vmatprep.mubr.f32.mxu0 %v1671_v15  ;;  %v1674_v26 = vmul.f32 %v4357_v23, %v4357_v23 }
 0x25c   :  { %v3104_v35 = vpop.f32.mrf.mxu0  ;;  %3225 = vmatmul.mubr.f32.vlgmr.msra.gmra.mxu0 %v1672_v32 }
 0x25d   :  { %v1673_v34 = vmul.f32 %v4360_v10, %v4360_v10  ;;  %v4367_v50 = vsub.f32 %v4084_v17, %v3104_v35 }
 0x25e   :  { %v1308_v42 = vpop.f32.mrf.mxu0 }
 0x25f   :  { %v4370_v40 = vsub.f32 %v4080_v43, %v1308_v42  ;;  %3227 = vmatprep.mubr.f32.mxu0 %v1673_v34  ;;  %v1676_v0 = vmul.f32 %v4367_v50, %v4367_v50 }
 0x260   :  { %v3107_v61 = vpop.f32.mrf.mxu0  ;;  %3228 = vmatmul.mubr.f32.gmra.mxu0 %v1674_v26 }
 0x261   :  { %v1675_v38 = vmul.f32 %v4370_v40, %v4370_v40  ;;  %v4377_v15 = vsub.f32 %v4096_v19, %v3107_v61 }
 0x262   :  { %v1318_v32 = vpop.f32.mrf.mxu0 }
 0x263   :  { %v4380_v17 = vsub.f32 %v4092_v46, %v1318_v32  ;;  %3230 = vmatprep.mubr.f32.mxu0 %v1675_v38  ;;  %v1678_v42 = vmul.f32 %v4377_v15, %v4377_v15 }
 0x264   :  { %v3110_v35 = vpop.f32.mrf.mxu0  ;;  %3231 = vmatmul.mubr.f32.gmra.mxu0 %v1676_v0 }
 0x265   :  { %v1677_v43 = vmul.f32 %v4380_v17, %v4380_v17  ;;  %v4387_v34 = vsub.f32 %v4108_v21, %v3110_v35 }
 0x266   :  { %v1328_v26 = vpop.f32.mrf.mxu0 }
 0x267   :  { %v4390_v19 = vsub.f32 %v4104_v49, %v1328_v26  ;;  %3233 = vmatprep.mubr.f32.mxu1 %v1677_v43  ;;  %v1680_v38 = vmul.f32 %v4387_v34, %v4387_v34 }
 0x268   :  { %v3113_v61 = vpop.f32.mrf.mxu0  ;;  %3234 = vmatmul.mubr.f32.vlgmr.msra.gmra.mxu1 %v1678_v42 }
 0x269   :  { %v1679_v46 = vmul.f32 %v4390_v19, %v4390_v19  ;;  %v4397_v0 = vsub.f32 %v4120_v24, %v3113_v61 }
 0x26a   :  { %v1338_v32 = vpop.f32.mrf.mxu0 }
 0x26b   :  { %v4400_v21 = vsub.f32 %v4116_v51, %v1338_v32  ;;  %3236 = vmatprep.mubr.f32.mxu1 %v1679_v46  ;;  %v1682_v43 = vmul.f32 %v4397_v0, %v4397_v0 }
 0x26c   :  { %v3116_v35 = vpop.f32.mrf.mxu0  ;;  %3237 = vmatmul.mubr.f32.gmra.mxu1 %v1680_v38 }
 0x26d   :  { %v1681_v49 = vmul.f32 %v4400_v21, %v4400_v21  ;;  %v4407_v42 = vsub.f32 %v4132_v31, %v3116_v35 }
 0x26e   :  { %v1348_v26 = vpop.f32.mrf.mxu0 }
 0x26f   :  { %v4410_v24 = vsub.f32 %v4128_v54, %v1348_v26  ;;  %3239 = vmatprep.mubr.f32.mxu1 %v1681_v49  ;;  %v1684_v46 = vmul.f32 %v4407_v42, %v4407_v42 }
 0x270   :  { %v3119_v61 = vpop.f32.mrf.mxu0  ;;  %3240 = vmatmul.mubr.f32.gmra.mxu1 %v1682_v43 }
 0x271   :  { %v1683_v51 = vmul.f32 %v4410_v24, %v4410_v24  ;;  %v4417_v38 = vsub.f32 %v4144_v39, %v3119_v61 }
 0x272   :  { %v1358_v32 = vpop.f32.mrf.mxu0 }
 0x273   :  { %v4420_v31 = vsub.f32 %v4140_v57, %v1358_v32  ;;  %3242 = vmatprep.mubr.f32.mxu1 %v1683_v51  ;;  %v1686_v49 = vmul.f32 %v4417_v38, %v4417_v38 }
 0x274   :  { %v3122_v35 = vpop.f32.mrf.mxu0  ;;  %3243 = vmatmul.mubr.f32.gmra.mxu1 %v1684_v46 }
 0x275   :  { %v1685_v54 = vmul.f32 %v4420_v31, %v4420_v31  ;;  %v4427_v43 = vsub.f32 %v4156_v47, %v3122_v35 }
 0x276   :  { %v1368_v26 = vpop.f32.mrf.mxu0 }
 0x277   :  { %v4430_v39 = vsub.f32 %v4152_v59, %v1368_v26  ;;  %3245 = vmatprep.mubr.f32.mxu1 %v1685_v54  ;;  %v1688_v51 = vmul.f32 %v4427_v43, %v4427_v43 }
 0x278   :  { %v3125_v61 = vpop.f32.mrf.mxu0  ;;  %3246 = vmatmul.mubr.f32.gmra.mxu1 %v1686_v49 }
 0x279   :  { %v1687_v57 = vmul.f32 %v4430_v39, %v4430_v39  ;;  %v4437_v46 = vsub.f32 %v4166_v63, %v3125_v61 }
 0x27a   :  { %v1378_v32 = vpop.f32.mrf.mxu0 }
 0x27b   :  { %v4440_v47 = vsub.f32 %v4163_v62, %v1378_v32  ;;  %3248 = vmatprep.mubr.f32.mxu1 %v1687_v57  ;;  %v1690_v54 = vmul.f32 %v4437_v46, %v4437_v46 }
 0x27c   :  { %v3128_v35 = vpop.f32.mrf.mxu0  ;;  %3249 = vmatmul.mubr.f32.gmra.mxu1 %v1688_v51 }
 0x27d   :  { %v1689_v59 = vmul.f32 %v4440_v47, %v4440_v47  ;;  %v4447_v49 = vsub.f32 %v4174_v60, %v3128_v35 }
 0x27e   :  { %v1388_v26 = vpop.f32.mrf.mxu0 }
 0x27f   :  { %v4450_v63 = vsub.f32 %v4171_v1, %v1388_v26  ;;  %3251 = vmatprep.mubr.f32.mxu1 %v1689_v59  ;;  %v1692_v57 = vmul.f32 %v4447_v49, %v4447_v49 }
 0x280   :  { %v3131_v61 = vpop.f32.mrf.mxu0  ;;  %3252 = vmatmul.mubr.f32.gmra.mxu1 %v1690_v54 }
 0x281   :  { %v1691_v62 = vmul.f32 %v4450_v63, %v4450_v63  ;;  %v4457_v51 = vsub.f32 %v4182_v5, %v3131_v61 }
 0x282   :  { %v1398_v32 = vpop.f32.mrf.mxu0 }
 0x283   :  { %v4460_v60 = vsub.f32 %v4179_v4, %v1398_v32  ;;  %3254 = vmatprep.mubr.f32.mxu1 %v1691_v62  ;;  %v1694_v59 = vmul.f32 %v4457_v51, %v4457_v51 }
 0x284   :  { %v3134_v35 = vpop.f32.mrf.mxu0  ;;  %3255 = vmatmul.mubr.f32.gmra.mxu1 %v1692_v57 }
 0x285   :  { %v1693_v1 = vmul.f32 %v4460_v60, %v4460_v60  ;;  %v4467_v54 = vsub.f32 %v4190_v9, %v3134_v35 }
 0x286   :  { %v1408_v26 = vpop.f32.mrf.mxu0 }
 0x287   :  { %v4470_v5 = vsub.f32 %v4187_v8, %v1408_v26  ;;  %3257 = vmatprep.mubr.f32.mxu1 %v1693_v1  ;;  %v1696_v62 = vmul.f32 %v4467_v54, %v4467_v54 }
 0x288   :  { %v3137_v61 = vpop.f32.mrf.mxu0  ;;  %3258 = vmatmul.mubr.f32.gmra.mxu1 %v1694_v59 }
 0x289   :  { %v1695_v4 = vmul.f32 %v4470_v5, %v4470_v5  ;;  %v4477_v57 = vsub.f32 %v4198_v13, %v3137_v61 }
 0x28a   :  { %v1418_v32 = vpop.f32.mrf.mxu0 }
 0x28b   :  { %v4480_v9 = vsub.f32 %v4195_v12, %v1418_v32  ;;  %3260 = vmatprep.mubr.f32.mxu1 %v1695_v4  ;;  %v1698_v1 = vmul.f32 %v4477_v57, %v4477_v57 }
 0x28c   :  { %v3140_v35 = vpop.f32.mrf.mxu0  ;;  %3261 = vmatmul.mubr.f32.gmra.mxu1 %v1696_v62 }
 0x28d   :  { %v1697_v8 = vmul.f32 %v4480_v9, %v4480_v9  ;;  %v4487_v59 = vsub.f32 %v4206_v25, %v3140_v35 }
 0x28e   :  { %v1428_v26 = vpop.f32.mrf.mxu0 }
 0x28f   :  { %v4490_v13 = vsub.f32 %v4203_v16, %v1428_v26  ;;  %3263 = vmatprep.mubr.f32.mxu1 %v1697_v8  ;;  %v1700_v4 = vmul.f32 %v4487_v59, %v4487_v59 }
 0x290   :  { %v3143_v61 = vpop.f32.mrf.mxu0  ;;  %3264 = vmatmul.mubr.f32.gmra.mxu1 %v1698_v1 }
 0x291   :  { %v1699_v12 = vmul.f32 %v4490_v13, %v4490_v13  ;;  %v4497_v62 = vsub.f32 %v4214_v29, %v3143_v61 }
 0x292   :  { %v1438_v32 = vpop.f32.mrf.mxu0 }
 0x293   :  { %v4500_v25 = vsub.f32 %v4211_v28, %v1438_v32  ;;  %3266 = vmatprep.mubr.f32.mxu1 %v1699_v12  ;;  %v1702_v8 = vmul.f32 %v4497_v62, %v4497_v62 }
 0x294   :  { %v3146_v35 = vpop.f32.mrf.mxu0  ;;  %3267 = vmatmul.mubr.f32.gmra.mxu1 %v1700_v4 }
 0x295   :  { %v1701_v16 = vmul.f32 %v4500_v25, %v4500_v25  ;;  %v4507_v1 = vsub.f32 %v4222_v41, %v3146_v35 }
 0x296   :  { %v1448_v26 = vpop.f32.mrf.mxu0 }
 0x297   :  { %v4510_v29 = vsub.f32 %v4219_v37, %v1448_v26  ;;  %3269 = vmatprep.mubr.f32.mxu1 %v1701_v16  ;;  %v1704_v12 = vmul.f32 %v4507_v1, %v4507_v1 }
 0x298   :  { %v3149_v61 = vpop.f32.mrf.mxu0  ;;  %3270 = vmatmul.mubr.f32.gmra.mxu1 %v1702_v8 }
 0x299   :  { %v1703_v28 = vmul.f32 %v4510_v29, %v4510_v29  ;;  %v4517_v4 = vsub.f32 %v4230_v48, %v3149_v61 }
 0x29a   :  { %v1458_v32 = vpop.f32.mrf.mxu0 }
 0x29b   :  { %v4520_v41 = vsub.f32 %v4227_v18, %v1458_v32  ;;  %3272 = vmatprep.mubr.f32.mxu1 %v1703_v28  ;;  %v1706_v16 = vmul.f32 %v4517_v4, %v4517_v4 }
 0x29c   :  { %v3152_v35 = vpop.f32.mrf.mxu0  ;;  %3273 = vmatmul.mubr.f32.gmra.mxu1 %v1704_v12 }
 0x29d   :  { %v1705_v37 = vmul.f32 %v4520_v41, %v4520_v41  ;;  %v4527_v8 = vsub.f32 %v4238_v53, %v3152_v35 }
 0x29e   :  { %v1468_v26 = vpop.f32.mrf.mxu0 }
 0x29f   :  { %v4530_v48 = vsub.f32 %v4235_v22, %v1468_v26  ;;  %3275 = vmatprep.mubr.f32.mxu1 %v1705_v37  ;;  %v1708_v28 = vmul.f32 %v4527_v8, %v4527_v8 }
 0x2a0   :  { %v3155_v61 = vpop.f32.mrf.mxu0  ;;  %3276 = vmatmul.mubr.f32.gmra.mxu1 %v1706_v16 }
 0x2a1   :  { %v1707_v18 = vmul.f32 %v4530_v48, %v4530_v48  ;;  %v4537_v12 = vsub.f32 %v4246_v58, %v3155_v61 }
 0x2a2   :  { %v1478_v32 = vpop.f32.mrf.mxu0 }
 0x2a3   :  { %v4540_v53 = vsub.f32 %v4243_v36, %v1478_v32  ;;  %3278 = vmatprep.mubr.f32.mxu1 %v1707_v18  ;;  %v1710_v37 = vmul.f32 %v4537_v12, %v4537_v12 }
 0x2a4   :  { %v3158_v35 = vpop.f32.mrf.mxu0  ;;  %3279 = vmatmul.mubr.f32.gmra.mxu1 %v1708_v28 }
 0x2a5   :  { %v1709_v22 = vmul.f32 %v4540_v53, %v4540_v53  ;;  %v4547_v16 = vsub.f32 %v4254_v55, %v3158_v35 }
 0x2a6   :  { %v1488_v26 = vpop.f32.mrf.mxu0 }
 0x2a7   :  { %v4550_v58 = vsub.f32 %v4251_v52, %v1488_v26  ;;  %3281 = vmatprep.mubr.f32.mxu1 %v1709_v22  ;;  %v1712_v18 = vmul.f32 %v4547_v16, %v4547_v16 }
 0x2a8   :  { %v3161_v61 = vpop.f32.mrf.mxu0  ;;  %3282 = vmatmul.mubr.f32.gmra.mxu1 %v1710_v37 }
 0x2a9   :  { %v1711_v36 = vmul.f32 %v4550_v58, %v4550_v58  ;;  %v4557_v28 = vsub.f32 %v4262_v6, %v3161_v61 }
 0x2aa   :  { %v1498_v32 = vpop.f32.mrf.mxu0 }
 0x2ab   :  { %v4560_v55 = vsub.f32 %v4259_v3, %v1498_v32  ;;  %3284 = vmatprep.mubr.f32.mxu1 %v1711_v36  ;;  %v1714_v22 = vmul.f32 %v4557_v28, %v4557_v28 }
 0x2ac   :  { %v3164_v35 = vpop.f32.mrf.mxu0  ;;  %3285 = vmatmul.mubr.f32.gmra.mxu1 %v1712_v18 }
 0x2ad   :  { %v1713_v52 = vmul.f32 %v4560_v55, %v4560_v55  ;;  %v4567_v37 = vsub.f32 %v4270_v14, %v3164_v35 }
 0x2ae   :  { %v1508_v26 = vpop.f32.mrf.mxu0 }
 0x2af   :  { %v4570_v6 = vsub.f32 %v4267_v11, %v1508_v26  ;;  %3287 = vmatprep.mubr.f32.mxu1 %v1713_v52  ;;  %v1716_v36 = vmul.f32 %v4567_v37, %v4567_v37 }
 0x2b0   :  { %v3167_v61 = vpop.f32.mrf.mxu0  ;;  %3288 = vmatmul.mubr.f32.gmra.mxu1 %v1714_v22 }
 0x2b1   :  { %v1715_v3 = vmul.f32 %v4570_v6, %v4570_v6  ;;  %v4577_v18 = vsub.f32 %v4278_v33, %v3167_v61 }
 0x2b2   :  { %v1518_v32 = vpop.f32.mrf.mxu0 }
 0x2b3   :  { %v4580_v14 = vsub.f32 %v4275_v27, %v1518_v32  ;;  %3290 = vmatprep.mubr.f32.mxu1 %v1715_v3  ;;  %v1718_v52 = vmul.f32 %v4577_v18, %v4577_v18 }
 0x2b4   :  { %v3170_v35 = vpop.f32.mrf.mxu0  ;;  %3291 = vmatmul.mubr.f32.gmra.mxu1 %v1716_v36 }
 0x2b5   :  { %4915 = vst [vmem:[#allocation16_spill] sm:$0xff] %v4580_v14  ;;  %v1717_v11 = vmul.f32 %v4580_v14, %v4580_v14  ;;  %v4587_v22 = vsub.f32 %v4286_v20, %v3170_v35 }
 0x2b6   :  { %v1528_v26 = vpop.f32.mrf.mxu0 }
 0x2b7   :  { %4916 = vst [vmem:[#allocation17_spill] sm:$0xff] %v4587_v22  ;;  %v4590_v33 = vsub.f32 %v4283_v45, %v1528_v26  ;;  %3293 = vmatprep.mubr.f32.mxu1 %v1717_v11  ;;  %v1720_v3 = vmul.f32 %v4587_v22, %v4587_v22 }
 0x2b8   :  { %v3173_v61 = vpop.f32.mrf.mxu0  ;;  %3294 = vmatmul.mubr.f32.gmra.mxu1 %v1718_v52 }
 0x2b9   :  { %4917 = vst [vmem:[#allocation18_spill] sm:$0xff] %v4590_v33  ;;  %v1719_v27 = vmul.f32 %v4590_v33, %v4590_v33  ;;  %v4597_v36 = vsub.f32 %v4294_v44, %v3173_v61  ;;  %v4921_v33 = vld [vmem:[#allocation5_spill] sm:$0xff] }
 0x2ba   :  { %v1538_v32 = vpop.f32.mrf.mxu0 }
 0x2bb   :  { %4918 = vst [vmem:[#allocation19_spill] sm:$0xff] %v4597_v36  ;;  %v4600_v20 = vsub.f32 %v4291_v56, %v1538_v32  ;;  %3296 = vmatprep.mubr.f32.mxu1 %v1719_v27  ;;  %v1722_v11 = vmul.f32 %v4597_v36, %v4597_v36  ;;  %v4925_v36 = vld [vmem:[#allocation6_spill] sm:$0xff] }
 0x2bc   :  { %v3176_v35 = vpop.f32.mrf.mxu0  ;;  %3297 = vmatmul.mubr.f32.gmra.mxu1 %v1720_v3  ;;  %v4923_v3 = vld [vmem:[#allocation7_spill] sm:$0xff] }
 0x2bd   :  { %4919 = vst [vmem:[#allocation20_spill] sm:$0xff] %v4600_v20  ;;  %v1721_v45 = vmul.f32 %v4600_v20, %v4600_v20  ;;  %v4607_v52 = vsub.f32 %v4302_v7, %v3176_v35 }
 0x2be   :  { %v1548_v26 = vpop.f32.mrf.mxu0 }
 0x2bf   :  { %4920 = vst [vmem:[#allocation21_spill] sm:$0xff] %v4607_v52  ;;  %v4610_v44 = vsub.f32 %v4921_v33, %v1548_v26  ;;  %3299 = vmatprep.mubr.f32.mxu1 %v1721_v45  ;;  %v1724_v27 = vmul.f32 %v4607_v52, %v4607_v52  ;;  %v4929_v52 = vld [vmem:[#allocation8_spill] sm:$0xff] }
 0x2c0   :  { %v3179_v61 = vpop.f32.mrf.mxu0  ;;  %3300 = vmatmul.mubr.f32.gmra.mxu1 %v1722_v11  ;;  %v4927_v11 = vld [vmem:[#allocation9_spill] sm:$0xff] }
 0x2c1   :  { %4922 = vst [vmem:[#allocation5_spill] sm:$0xff] %v4610_v44  ;;  %v1723_v56 = vmul.f32 %v4610_v44, %v4610_v44  ;;  %v4617_v32 = vsub.f32 %v4923_v3, %v3179_v61 }
 0x2c2   :  { %v1558_v20 = vpop.f32.mrf.mxu0 }
 0x2c3   :  { %4924 = vst [vmem:[#allocation7_spill] sm:$0xff] %v4617_v32  ;;  %v4620_v7 = vsub.f32 %v4925_v36, %v1558_v20  ;;  %3302 = vmatprep.mubr.f32.mxu1 %v1723_v56  ;;  %v1726_v45 = vmul.f32 %v4617_v32, %v4617_v32  ;;  %v4931_v56 = vld [vmem:[#allocation11_spill] sm:$0xff]  ;;  %v4933_v32 = vld [vmem:[#allocation10_spill] sm:$0xff] }
 0x2c4   :  { %v3182_v35 = vpop.f32.mrf.mxu0  ;;  %3303 = vmatmul.mubr.f32.gmra.mxu1 %v1724_v27 }
 0x2c5   :  { %4926 = vst [vmem:[#allocation6_spill] sm:$0xff] %v4620_v7  ;;  %v1725_v33 = vmul.f32 %v4620_v7, %v4620_v7  ;;  %v4627_v26 = vsub.f32 %v4927_v11, %v3182_v35 }
 0x2c6   :  { %v1568_v44 = vpop.f32.mrf.mxu0 }
 0x2c7   :  { %4928 = vst [vmem:[#allocation9_spill] sm:$0xff] %v4627_v26  ;;  %v4630_v61 = vsub.f32 %v4929_v52, %v1568_v44  ;;  %3305 = vmatprep.mubr.f32.mxu1 %v1725_v33  ;;  %v1728_v20 = vmul.f32 %v4627_v26, %v4627_v26 }
 0x2c8   :  { %v3185_v3 = vpop.f32.mrf.mxu0  ;;  %3306 = vmatmul.mubr.f32.gmra.mxu1 %v1726_v45 }
 0x2c9   :  { %4930 = vst [vmem:[#allocation8_spill] sm:$0xff] %v4630_v61  ;;  %v1727_v36 = vmul.f32 %v4630_v61, %v4630_v61  ;;  %v4637_v27 = vsub.f32 %v4931_v56, %v3185_v3  ;;  %v4936_v61 = vld [vmem:[#allocation12_spill] sm:$0xff] }
 0x2ca   :  { %v1578_v7 = vpop.f32.mrf.mxu0 }
 0x2cb   :  { %4932 = vst [vmem:[#allocation11_spill] sm:$0xff] %v4637_v27  ;;  %v4640_v35 = vsub.f32 %v4933_v32, %v1578_v7  ;;  %3308 = vmatprep.mubr.f32.mxu1 %v1727_v36  ;;  %v1730_v44 = vmul.f32 %v4637_v27, %v4637_v27  ;;  %v4938_v36 = vld [vmem:[#allocation14_spill] sm:$0xff]  ;;  %v4940_v27 = vld [vmem:[#allocation13_spill] sm:$0xff] }
 0x2cc   :  { %v3188_v11 = vpop.f32.mrf.mxu0  ;;  %3309 = vmatmul.mubr.f32.gmra.mxu1 %v1728_v20 }
 0x2cd   :  { %4934 = vst [vmem:[#allocation10_spill] sm:$0xff] %v4640_v35  ;;  %v1729_v52 = vmul.f32 %v4640_v35, %v4640_v35  ;;  %v4647_v33 = vsub.f32 %v4334_v30, %v3188_v11 }
 0x2ce   :  { %v1588_v45 = vpop.f32.mrf.mxu0 }
 0x2cf   :  { %4935 = vst [vmem:[#allocation22_spill] sm:$0xff] %v4647_v33  ;;  %v4650_v3 = vsub.f32 %v4936_v61, %v1588_v45  ;;  %3311 = vmatprep.mubr.f32.mxu1 %v1729_v52  ;;  %v1732_v7 = vmul.f32 %v4647_v33, %v4647_v33 }
 0x2d0   :  { %v3191_v56 = vpop.f32.mrf.mxu0  ;;  %3312 = vmatmul.mubr.f32.gmra.mxu1 %v1730_v44 }
 0x2d1   :  { %4937 = vst [vmem:[#allocation12_spill] sm:$0xff] %v4650_v3  ;;  %v1731_v32 = vmul.f32 %v4650_v3, %v4650_v3  ;;  %v4657_v20 = vsub.f32 %v4938_v36, %v3191_v56 }
 0x2d2   :  { %v1598_v35 = vpop.f32.mrf.mxu0 }
 0x2d3   :  { %4939 = vst [vmem:[#allocation14_spill] sm:$0xff] %v4657_v20  ;;  %v4660_v30 = vsub.f32 %v4940_v27, %v1598_v35  ;;  %3314 = vmatprep.mubr.f32.mxu1 %v1731_v32  ;;  %v1734_v11 = vmul.f32 %v4657_v20, %v4657_v20 }
 0x2d4   :  { %3315 = vmatmul.mubr.f32.gmra.mxu1 %v1732_v7 }
 0x2d5   :  { %4941 = vst [vmem:[#allocation13_spill] sm:$0xff] %v4660_v30  ;;  %v1733_v61 = vmul.f32 %v4660_v30, %v4660_v30 }
 0x2d7   :  { %3317 = vmatprep.mubr.f32.mxu1 %v1733_v61 }
 0x2d8   :  { %3318 = vmatmul.mubr.f32.gmra.mxu1 %v1734_v11 }
 0x31c   :  { %v3226_v52 = vpop.f32.mrf.mxu0 }
 0x31d   :  { %v1807_v44 = vadd.f32 1e-05, %v3226_v52 }
 0x31e   :  { %v1801_v45 = vpop.f32.mrf.mxu0 }
 0x31f   :  { %3355 = vrsqrt.f32 %v1807_v44  ;;  %v1802_v56 = vadd.f32 1e-05, %v1801_v45  ;;  %v4669_v45 = vld [vmem:[%s4872_s1 + $0x2] ss:$0 sm:$0xff] }
 0x320   :  { %v3229_v36 = vpop.f32.mrf.mxu0 }
 0x321   :  { %3357 = vrsqrt.f32 %v1802_v56  ;;  %v1817_v3 = vadd.f32 1e-05, %v3229_v36 }
 0x322   :  { %v1811_v27 = vpop.f32.mrf.mxu0 }
 0x323   :  { %3359 = vrsqrt.f32 %v1817_v3  ;;  %v1812_v35 = vadd.f32 1e-05, %v1811_v27 }
 0x324   :  { %v3232_v32 = vpop.f32.mrf.mxu0 }
 0x325   :  { %3361 = vrsqrt.f32 %v1812_v35  ;;  %v1827_v7 = vadd.f32 1e-05, %v3232_v32  ;;  %v4942_v35 = vld [vmem:[#allocation15_spill] sm:$0xff] }
 0x326   :  { %v1821_v30 = vpop.f32.mrf.mxu0 }
 0x327   :  { %3363 = vrsqrt.f32 %v1827_v7  ;;  %v1822_v33 = vadd.f32 1e-05, %v1821_v30 }
 0x328   :  { %v3235_v20 = vpop.f32.mrf.mxu1 }
 0x329   :  { %3365 = vrsqrt.f32 %v1822_v33  ;;  %v1837_v61 = vadd.f32 1e-05, %v3235_v20  ;;  %v4675_v33 = vld [vmem:[%s4872_s1 + $0x3] ss:$0 sm:$0xff]  ;;  %s3505_s1 = smov [#allocation2]  }
 0x32a   :  { %v1831_v11 = vpop.f32.mrf.mxu1  ;;  %s2453_s29 = sshll.u32 %s3505_s1, 4  ;;  %s2454_s29 = int_to_ptr.vmem [resolvable:$true] %s2453_s29 }
 0x32b   :  { %3367 = vrsqrt.f32 %v1837_v61  ;;  %v1832_v52 = vadd.f32 1e-05, %v1831_v11  ;;  %s3483_s30 = scalar_lea.vmem %s2454_s29, 8192  ;;  %p3488_p1 = scmp.lt.s32.totalorder %s2454_s29, %s2454_s29 }
 0x32c   :  { %v3356_v44 = vpop.eup %3355  ;;  %v3238_v3 = vpop.f32.mrf.mxu1  ;;  %p3484_p0 = scmp.ne.s32.totalorder %s2454_s29, %s3483_s30  ;;  %p3489_p2 = scmp.lt.s32.totalorder %s3483_s30, %s3483_s30 }
 0x32d   :  { %v2185_v56 = vmul.f32 %v3356_v44, %v4347_v2  ;;  %3369 = vrsqrt.f32 %v1832_v52  ;;  %v1847_v36 = vadd.f32 1e-05, %v3238_v3 }
 0x32e   :  { %v3358_v27 = vpop.eup %3357  ;;  %v1841_v20 = vpop.f32.mrf.mxu1  ;;  %p3490_p3 = por %p3489_p2, %p3488_p1 }
 0x32f   :  { %v2253_v30 = vmul.f32 %v4669_v45, %v2185_v56  ;;  %v2184_v32 = vmul.f32 %v3358_v27, %v4942_v35  ;;  %3371 = vrsqrt.f32 %v1847_v36  ;;  %v1842_v7 = vadd.f32 1e-05, %v1841_v20 }
 0x330   :  { %v3360_v61 = vpop.eup %3359  ;;  %v3241_v11 = vpop.f32.mrf.mxu1  ;;  %p3491_p4 = pnand %p3490_p3, %p3484_p0 }
 0x331   :  { %v2321_v26 = vadd.f32 %v4675_v33, %v2253_v30  ;;  %v2252_v2 = vmul.f32 %v4669_v45, %v2184_v32  ;;  %v2187_v52 = vmul.f32 %v3360_v61, %v4357_v23  ;;  %3373 = vrsqrt.f32 %v1842_v7 }
 0x332   :  { %v3362_v44 = vpop.eup %3361  ;;  %v1857_v3 = vadd.f32 1e-05, %v3241_v11  ;;  %v1851_v22 = vpop.f32.mrf.mxu1 }
 0x333   :  { %2385 = vst [vmem:[#allocation2 + $0x8] sm:$0xff] %v2321_v26  ;;  %v2320_v14 = vadd.f32 %v4675_v33, %v2252_v2  ;;  %v2255_v56 = vmul.f32 %v4669_v45, %v2187_v52  ;;  %v2186_v36 = vmul.f32 %v3362_v44, %v4360_v10  ;;  %v1852_v27 = vadd.f32 1e-05, %v1851_v22 }
 0x334   :  { %v3364_v20 = vpop.eup %3363  ;;  %3375 = vrsqrt.f32 %v1857_v3  ;;  %v3244_v35 = vpop.f32.mrf.mxu1 }
 0x335   :  { %2384 = vst [vmem:[#allocation2] sm:$0xff] %v2320_v14  ;;  %v2323_v30 = vadd.f32 %v4675_v33, %v2255_v56  ;;  %v2254_v23 = vmul.f32 %v4669_v45, %v2186_v36  ;;  %v2189_v32 = vmul.f32 %v3364_v20, %v4367_v50  ;;  %3377 = vrsqrt.f32 %v1852_v27 }
 0x336   :  { %v3366_v7 = vpop.eup %3365  ;;  %v1867_v26 = vadd.f32 1e-05, %v3244_v35  ;;  %v1861_v61 = vpop.f32.mrf.mxu1 }
 0x337   :  { %2387 = vst [vmem:[#allocation2 + $0x18] sm:$0xff] %v2323_v30  ;;  %v2322_v11 = vadd.f32 %v4675_v33, %v2254_v23  ;;  %v2257_v10 = vmul.f32 %v4669_v45, %v2189_v32  ;;  %v2188_v22 = vmul.f32 %v3366_v7, %v4370_v40  ;;  %v1862_v2 = vadd.f32 1e-05, %v1861_v61 }
 0x338   :  { %v3368_v52 = vpop.eup %3367  ;;  %3379 = vrsqrt.f32 %v1867_v26  ;;  %v3247_v14 = vpop.f32.mrf.mxu1 }
 0x339   :  { %2386 = vst [vmem:[#allocation2 + $0x10] sm:$0xff] %v2322_v11  ;;  %v2325_v44 = vadd.f32 %v4675_v33, %v2257_v10  ;;  %v2256_v50 = vmul.f32 %v4669_v45, %v2188_v22  ;;  %v2191_v3 = vmul.f32 %v3368_v52, %v4377_v15  ;;  %3381 = vrsqrt.f32 %v1862_v2 }
 0x33a   :  { %v3370_v56 = vpop.eup %3369  ;;  %v1877_v36 = vadd.f32 1e-05, %v3247_v14  ;;  %v1871_v27 = vpop.f32.mrf.mxu1 }
 0x33b   :  { %2389 = vst [vmem:[#allocation2 + $0x28] sm:$0xff] %v2325_v44  ;;  %v2324_v20 = vadd.f32 %v4675_v33, %v2256_v50  ;;  %v2259_v40 = vmul.f32 %v4669_v45, %v2191_v3  ;;  %v2190_v35 = vmul.f32 %v3370_v56, %v4380_v17  ;;  %v1872_v30 = vadd.f32 1e-05, %v1871_v27 }
 0x33c   :  { %v3372_v23 = vpop.eup %3371  ;;  %3383 = vrsqrt.f32 %v1877_v36  ;;  %v3250_v32 = vpop.f32.mrf.mxu1 }
 0x33d   :  { %2388 = vst [vmem:[#allocation2 + $0x20] sm:$0xff] %v2324_v20  ;;  %v2327_v7 = vadd.f32 %v4675_v33, %v2259_v40  ;;  %v2258_v15 = vmul.f32 %v4669_v45, %v2190_v35  ;;  %v2193_v26 = vmul.f32 %v3372_v23, %v4387_v34  ;;  %3385 = vrsqrt.f32 %v1872_v30 }
 0x33e   :  { %v3374_v61 = vpop.eup %3373  ;;  %v1887_v11 = vadd.f32 1e-05, %v3250_v32  ;;  %v1881_v10 = vpop.f32.mrf.mxu1 }
 0x33f   :  { %2391 = vst [vmem:[#allocation2 + $0x38] sm:$0xff] %v2327_v7  ;;  %v2326_v22 = vadd.f32 %v4675_v33, %v2258_v15  ;;  %v2261_v17 = vmul.f32 %v4669_v45, %v2193_v26  ;;  %v2192_v2 = vmul.f32 %v3374_v61, %v4390_v19  ;;  %v1882_v52 = vadd.f32 1e-05, %v1881_v10 }
 0x340   :  { %3387 = vrsqrt.f32 %v1887_v11  ;;  %v3253_v14 = vpop.f32.mrf.mxu1 }
 0x341   :  { %v3376_v44 = vpop.eup %3375  ;;  %2390 = vst [vmem:[#allocation2 + $0x30] sm:$0xff] %v2326_v22  ;;  %v2329_v50 = vadd.f32 %v4675_v33, %v2261_v17  ;;  %v2260_v34 = vmul.f32 %v4669_v45, %v2192_v2  ;;  %3389 = vrsqrt.f32 %v1882_v52  ;;  %v1897_v3 = vadd.f32 1e-05, %v3253_v14 }
 0x342   :  { %v3378_v56 = vpop.eup %3377  ;;  %v2195_v36 = vmul.f32 %v3376_v44, %v4397_v0  ;;  %v1891_v27 = vpop.f32.mrf.mxu1 }
 0x343   :  { %2393 = vst [vmem:[#allocation2 + $0x48] sm:$0xff] %v2329_v50  ;;  %v2328_v20 = vadd.f32 %v4675_v33, %v2260_v34  ;;  %v2194_v19 = vmul.f32 %v3378_v56, %v4400_v21  ;;  %3391 = vrsqrt.f32 %v1897_v3  ;;  %v1892_v40 = vadd.f32 1e-05, %v1891_v27 }
 0x344   :  { %v2263_v35 = vmul.f32 %v4669_v45, %v2195_v36  ;;  %v3256_v30 = vpop.f32.mrf.mxu1 }
 0x345   :  { %v3380_v23 = vpop.eup %3379  ;;  %2392 = vst [vmem:[#allocation2 + $0x40] sm:$0xff] %v2328_v20  ;;  %v2262_v32 = vmul.f32 %v4669_v45, %v2194_v19  ;;  %3393 = vrsqrt.f32 %v1892_v40  ;;  %v1907_v7 = vadd.f32 1e-05, %v3256_v30 }
 0x346   :  { %v3382_v15 = vpop.eup %3381  ;;  %v2331_v0 = vadd.f32 %v4675_v33, %v2263_v35  ;;  %v2197_v26 = vmul.f32 %v3380_v23, %v4407_v42  ;;  %v1901_v61 = vpop.f32.mrf.mxu1 }
 0x347   :  { %v2330_v11 = vadd.f32 %v4675_v33, %v2262_v32  ;;  %v2196_v21 = vmul.f32 %v3382_v15, %v4410_v24  ;;  %3395 = vrsqrt.f32 %v1907_v7  ;;  %v1902_v10 = vadd.f32 1e-05, %v1901_v61 }
 0x348   :  { %2395 = vst [vmem:[#allocation2 + $0x58] sm:$0xff] %v2331_v0  ;;  %v2265_v22 = vmul.f32 %v4669_v45, %v2197_v26  ;;  %v3259_v17 = vpop.f32.mrf.mxu1 }
 0x349   :  { %v3384_v2 = vpop.eup %3383  ;;  %2394 = vst [vmem:[#allocation2 + $0x50] sm:$0xff] %v2330_v11  ;;  %v2264_v52 = vmul.f32 %v4669_v45, %v2196_v21  ;;  %3397 = vrsqrt.f32 %v1902_v10  ;;  %v1917_v14 = vadd.f32 1e-05, %v3259_v17 }
 0x34a   :  { %v3386_v44 = vpop.eup %3385  ;;  %v2333_v42 = vadd.f32 %v4675_v33, %v2265_v22  ;;  %v2199_v50 = vmul.f32 %v3384_v2, %v4417_v38  ;;  %v1911_v34 = vpop.f32.mrf.mxu1 }
 0x34b   :  { %v2332_v24 = vadd.f32 %v4675_v33, %v2264_v52  ;;  %v2198_v3 = vmul.f32 %v3386_v44, %v4420_v31  ;;  %3399 = vrsqrt.f32 %v1917_v14  ;;  %v1912_v56 = vadd.f32 1e-05, %v1911_v34 }
 0x34c   :  { %2397 = vst [vmem:[#allocation2 + $0x68] sm:$0xff] %v2333_v42  ;;  %v2267_v36 = vmul.f32 %v4669_v45, %v2199_v50  ;;  %v3262_v27 = vpop.f32.mrf.mxu1 }
 0x34d   :  { %v3388_v20 = vpop.eup %3387  ;;  %2396 = vst [vmem:[#allocation2 + $0x60] sm:$0xff] %v2332_v24  ;;  %v2266_v19 = vmul.f32 %v4669_v45, %v2198_v3  ;;  %3401 = vrsqrt.f32 %v1912_v56  ;;  %v1927_v40 = vadd.f32 1e-05, %v3262_v27 }
 0x34e   :  { %v3390_v35 = vpop.eup %3389  ;;  %v2335_v38 = vadd.f32 %v4675_v33, %v2267_v36  ;;  %v2201_v30 = vmul.f32 %v3388_v20, %v4427_v43  ;;  %v1921_v23 = vpop.f32.mrf.mxu1 }
 0x34f   :  { %v2334_v31 = vadd.f32 %v4675_v33, %v2266_v19  ;;  %v2200_v32 = vmul.f32 %v3390_v35, %v4430_v39  ;;  %3403 = vrsqrt.f32 %v1927_v40  ;;  %v1922_v7 = vadd.f32 1e-05, %v1921_v23 }
 0x350   :  { %v3392_v15 = vpop.eup %3391  ;;  %2399 = vst [vmem:[#allocation2 + $0x78] sm:$0xff] %v2335_v38  ;;  %v2269_v0 = vmul.f32 %v4669_v45, %v2201_v30  ;;  %v3265_v26 = vpop.f32.mrf.mxu1 }
 0x351   :  { %2398 = vst [vmem:[#allocation2 + $0x70] sm:$0xff] %v2334_v31  ;;  %v2268_v61 = vmul.f32 %v4669_v45, %v2200_v32  ;;  %v2203_v11 = vmul.f32 %v3392_v15, %v4437_v46  ;;  %3405 = vrsqrt.f32 %v1922_v7  ;;  %v1937_v21 = vadd.f32 1e-05, %v3265_v26 }
 0x352   :  { %v3394_v43 = vpop.eup %3393  ;;  %v2337_v10 = vadd.f32 %v4675_v33, %v2269_v0  ;;  %v1931_v22 = vpop.f32.mrf.mxu1 }
 0x353   :  { %v2336_v39 = vadd.f32 %v4675_v33, %v2268_v61  ;;  %v2271_v17 = vmul.f32 %v4669_v45, %v2203_v11  ;;  %v2202_v2 = vmul.f32 %v3394_v43, %v4440_v47  ;;  %3407 = vrsqrt.f32 %v1937_v21 }
 0x354   :  { %v3396_v52 = vpop.eup %3395  ;;  %2401 = vst [vmem:[#allocation2 + $0x88] sm:$0xff] %v2337_v10  ;;  %v1932_v14 = vadd.f32 1e-05, %v1931_v22  ;;  %v3268_v44 = vpop.f32.mrf.mxu1 }
 0x355   :  { %2400 = vst [vmem:[#allocation2 + $0x80] sm:$0xff] %v2336_v39  ;;  %v2339_v46 = vadd.f32 %v4675_v33, %v2271_v17  ;;  %v2270_v42 = vmul.f32 %v4669_v45, %v2202_v2  ;;  %v2205_v50 = vmul.f32 %v3396_v52, %v4447_v49  ;;  %v1947_v34 = vadd.f32 1e-05, %v3268_v44 }
 0x356   :  { %v3398_v24 = vpop.eup %3397  ;;  %3409 = vrsqrt.f32 %v1932_v14  ;;  %v1941_v3 = vpop.f32.mrf.mxu1 }
 0x357   :  { %2403 = vst [vmem:[#allocation2 + $0x98] sm:$0xff] %v2339_v46  ;;  %v2338_v56 = vadd.f32 %v4675_v33, %v2270_v42  ;;  %v2273_v47 = vmul.f32 %v4669_v45, %v2205_v50  ;;  %v2204_v36 = vmul.f32 %v3398_v24, %v4450_v63  ;;  %3411 = vrsqrt.f32 %v1947_v34 }
 0x358   :  { %v3400_v27 = vpop.eup %3399  ;;  %v1942_v20 = vadd.f32 1e-05, %v1941_v3  ;;  %v3271_v19 = vpop.f32.mrf.mxu1 }
 0x359   :  { %2402 = vst [vmem:[#allocation2 + $0x90] sm:$0xff] %v2338_v56  ;;  %v2341_v40 = vadd.f32 %v4675_v33, %v2273_v47  ;;  %v2272_v49 = vmul.f32 %v4669_v45, %v2204_v36  ;;  %v2207_v35 = vmul.f32 %v3400_v27, %v4457_v51  ;;  %v1957_v38 = vadd.f32 1e-05, %v3271_v19 }
 0x35a   :  { %v3402_v30 = vpop.eup %3401  ;;  %3413 = vrsqrt.f32 %v1942_v20  ;;  %v1951_v23 = vpop.f32.mrf.mxu1 }
 0x35b   :  { %2405 = vst [vmem:[#allocation2 + $0xa8] sm:$0xff] %v2341_v40  ;;  %v2340_v31 = vadd.f32 %v4675_v33, %v2272_v49  ;;  %v2275_v63 = vmul.f32 %v4669_v45, %v2207_v35  ;;  %v2206_v32 = vmul.f32 %v3402_v30, %v4460_v60  ;;  %3415 = vrsqrt.f32 %v1957_v38 }
 0x35c   :  { %v3404_v7 = vpop.eup %3403  ;;  %v1952_v15 = vadd.f32 1e-05, %v1951_v23  ;;  %v3274_v0 = vpop.f32.mrf.mxu1 }
 0x35d   :  { %2404 = vst [vmem:[#allocation2 + $0xa0] sm:$0xff] %v2340_v31  ;;  %v2343_v26 = vadd.f32 %v4675_v33, %v2275_v63  ;;  %v2274_v51 = vmul.f32 %v4669_v45, %v2206_v32  ;;  %v2209_v61 = vmul.f32 %v3404_v7, %v4467_v54  ;;  %v1967_v11 = vadd.f32 1e-05, %v3274_v0 }
 0x35e   :  { %v3406_v21 = vpop.eup %3405  ;;  %3417 = vrsqrt.f32 %v1952_v15  ;;  %v1961_v43 = vpop.f32.mrf.mxu1 }
 0x35f   :  { %2407 = vst [vmem:[#allocation2 + $0xb8] sm:$0xff] %v2343_v26  ;;  %v2342_v10 = vadd.f32 %v4675_v33, %v2274_v51  ;;  %v2277_v60 = vmul.f32 %v4669_v45, %v2209_v61  ;;  %v2208_v22 = vmul.f32 %v3406_v21, %v4470_v5  ;;  %3419 = vrsqrt.f32 %v1967_v11 }
 0x360   :  { %v3408_v39 = vpop.eup %3407  ;;  %v1962_v17 = vadd.f32 1e-05, %v1961_v43  ;;  %v3277_v2 = vpop.f32.mrf.mxu1 }
 0x361   :  { %2406 = vst [vmem:[#allocation2 + $0xb0] sm:$0xff] %v2342_v10  ;;  %v2345_v52 = vadd.f32 %v4675_v33, %v2277_v60  ;;  %v2276_v54 = vmul.f32 %v4669_v45, %v2208_v22  ;;  %v2211_v14 = vmul.f32 %v3408_v39, %v4477_v57  ;;  %v1977_v44 = vadd.f32 1e-05, %v3277_v2 }
 0x362   :  { %3421 = vrsqrt.f32 %v1962_v17  ;;  %v1971_v46 = vpop.f32.mrf.mxu1 }
 0x363   :  { %v3410_v42 = vpop.eup %3409  ;;  %2409 = vst [vmem:[#allocation2 + $0xc8] sm:$0xff] %v2345_v52  ;;  %v2344_v50 = vadd.f32 %v4675_v33, %v2276_v54  ;;  %v2279_v5 = vmul.f32 %v4669_v45, %v2211_v14  ;;  %3423 = vrsqrt.f32 %v1977_v44  ;;  %v1972_v34 = vadd.f32 1e-05, %v1971_v46 }
 0x364   :  { %v3412_v24 = vpop.eup %3411  ;;  %v2210_v3 = vmul.f32 %v3410_v42, %v4480_v9  ;;  %v3280_v56 = vpop.f32.mrf.mxu1 }
 0x365   :  { %2408 = vst [vmem:[#allocation2 + $0xc0] sm:$0xff] %v2344_v50  ;;  %v2347_v47 = vadd.f32 %v4675_v33, %v2279_v5  ;;  %v2213_v57 = vmul.f32 %v3412_v24, %v4487_v59  ;;  %3425 = vrsqrt.f32 %v1972_v34  ;;  %v1987_v36 = vadd.f32 1e-05, %v3280_v56 }
 0x366   :  { %v2278_v27 = vmul.f32 %v4669_v45, %v2210_v3  ;;  %v1981_v20 = vpop.f32.mrf.mxu1 }
 0x367   :  { %v3414_v19 = vpop.eup %3413  ;;  %2411 = vst [vmem:[#allocation2 + $0xd8] sm:$0xff] %v2347_v47  ;;  %v2281_v40 = vmul.f32 %v4669_v45, %v2213_v57  ;;  %3427 = vrsqrt.f32 %v1987_v36  ;;  %v1982_v49 = vadd.f32 1e-05, %v1981_v20 }
 0x368   :  { %v3416_v35 = vpop.eup %3415  ;;  %v2346_v9 = vadd.f32 %v4675_v33, %v2278_v27  ;;  %v2212_v38 = vmul.f32 %v3414_v19, %v4490_v13  ;;  %v3283_v30 = vpop.f32.mrf.mxu1 }
 0x369   :  { %v2349_v23 = vadd.f32 %v4675_v33, %v2281_v40  ;;  %v2215_v59 = vmul.f32 %v3416_v35, %v4497_v62  ;;  %3429 = vrsqrt.f32 %v1982_v49  ;;  %v1997_v31 = vadd.f32 1e-05, %v3283_v30 }
 0x36a   :  { %2410 = vst [vmem:[#allocation2 + $0xd0] sm:$0xff] %v2346_v9  ;;  %v2280_v63 = vmul.f32 %v4669_v45, %v2212_v38  ;;  %v1991_v32 = vpop.f32.mrf.mxu1 }
 0x36b   :  { %v3418_v7 = vpop.eup %3417  ;;  %2413 = vst [vmem:[#allocation2 + $0xe8] sm:$0xff] %v2349_v23  ;;  %v2283_v15 = vmul.f32 %v4669_v45, %v2215_v59  ;;  %3431 = vrsqrt.f32 %v1997_v31  ;;  %v1992_v0 = vadd.f32 1e-05, %v1991_v32 }
 0x36c   :  { %v3420_v26 = vpop.eup %3419  ;;  %v2348_v13 = vadd.f32 %v4675_v33, %v2280_v63  ;;  %v2214_v51 = vmul.f32 %v3418_v7, %v4500_v25  ;;  %v3286_v61 = vpop.f32.mrf.mxu1 }
 0x36d   :  { %v2351_v62 = vadd.f32 %v4675_v33, %v2283_v15  ;;  %v2217_v11 = vmul.f32 %v3420_v26, %v4507_v1  ;;  %3433 = vrsqrt.f32 %v1992_v0  ;;  %v2007_v21 = vadd.f32 1e-05, %v3286_v61 }
 0x36e   :  { %2412 = vst [vmem:[#allocation2 + $0xe0] sm:$0xff] %v2348_v13  ;;  %v2282_v43 = vmul.f32 %v4669_v45, %v2214_v51  ;;  %v2001_v10 = vpop.f32.mrf.mxu1 }
 0x36f   :  { %v3422_v60 = vpop.eup %3421  ;;  %2415 = vst [vmem:[#allocation2 + $0xf8] sm:$0xff] %v2351_v62  ;;  %v2285_v22 = vmul.f32 %v4669_v45, %v2217_v11  ;;  %3435 = vrsqrt.f32 %v2007_v21  ;;  %v2002_v39 = vadd.f32 1e-05, %v2001_v10 }
 0x370   :  { %v3424_v17 = vpop.eup %3423  ;;  %v2350_v25 = vadd.f32 %v4675_v33, %v2282_v43  ;;  %v2216_v2 = vmul.f32 %v3422_v60, %v4510_v29  ;;  %v3289_v52 = vpop.f32.mrf.mxu1 }
 0x371   :  { %v2353_v1 = vadd.f32 %v4675_v33, %v2285_v22  ;;  %v2219_v54 = vmul.f32 %v3424_v17, %v4517_v4  ;;  %3437 = vrsqrt.f32 %v2002_v39  ;;  %v2017_v14 = vadd.f32 1e-05, %v3289_v52 }
 0x372   :  { %v3426_v44 = vpop.eup %3425  ;;  %2414 = vst [vmem:[#allocation2 + $0xf0] sm:$0xff] %v2350_v25  ;;  %v2284_v46 = vmul.f32 %v4669_v45, %v2216_v2  ;;  %v2011_v42 = vpop.f32.mrf.mxu1 }
 0x373   :  { %2417 = vst [vmem:[#allocation2 + $0x108] sm:$0xff] %v2353_v1  ;;  %v2287_v50 = vmul.f32 %v4669_v45, %v2219_v54  ;;  %v2218_v5 = vmul.f32 %v3426_v44, %v4520_v41  ;;  %3439 = vrsqrt.f32 %v2017_v14  ;;  %v2012_v34 = vadd.f32 1e-05, %v2011_v42 }
 0x374   :  { %v3428_v29 = vpop.eup %3427  ;;  %v2352_v24 = vadd.f32 %v4675_v33, %v2284_v46  ;;  %v3292_v3 = vpop.f32.mrf.mxu1 }
 0x375   :  { %v2355_v4 = vadd.f32 %v4675_v33, %v2287_v50  ;;  %v2286_v56 = vmul.f32 %v4669_v45, %v2218_v5  ;;  %v2221_v47 = vmul.f32 %v3428_v29, %v4527_v8  ;;  %3441 = vrsqrt.f32 %v2012_v34 }
 0x376   :  { %v3430_v57 = vpop.eup %3429  ;;  %2416 = vst [vmem:[#allocation2 + $0x100] sm:$0xff] %v2352_v24  ;;  %v2027_v36 = vadd.f32 1e-05, %v3292_v3  ;;  %v2021_v27 = vpop.f32.mrf.mxu1 }
 0x377   :  { %2419 = vst [vmem:[#allocation2 + $0x118] sm:$0xff] %v2355_v4  ;;  %v2354_v41 = vadd.f32 %v4675_v33, %v2286_v56  ;;  %v2289_v20 = vmul.f32 %v4669_v45, %v2221_v47  ;;  %v2220_v19 = vmul.f32 %v3430_v57, %v4530_v48  ;;  %v2022_v40 = vadd.f32 1e-05, %v2021_v27 }
 0x378   :  { %v3432_v49 = vpop.eup %3431  ;;  %3443 = vrsqrt.f32 %v2027_v36  ;;  %v3295_v35 = vpop.f32.mrf.mxu1 }
 0x379   :  { %2418 = vst [vmem:[#allocation2 + $0x110] sm:$0xff] %v2354_v41  ;;  %v2357_v9 = vadd.f32 %v4675_v33, %v2289_v20  ;;  %v2288_v8 = vmul.f32 %v4669_v45, %v2220_v19  ;;  %v2223_v38 = vmul.f32 %v3432_v49, %v4537_v12  ;;  %3445 = vrsqrt.f32 %v2022_v40 }
 0x37a   :  { %v3434_v30 = vpop.eup %3433  ;;  %v2037_v23 = vadd.f32 1e-05, %v3295_v35  ;;  %v2031_v59 = vpop.f32.mrf.mxu1 }
 0x37b   :  { %2421 = vst [vmem:[#allocation2 + $0x128] sm:$0xff] %v2357_v9  ;;  %v2356_v31 = vadd.f32 %v4675_v33, %v2288_v8  ;;  %v2291_v48 = vmul.f32 %v4669_v45, %v2223_v38  ;;  %v2222_v63 = vmul.f32 %v3434_v30, %v4540_v53  ;;  %v2032_v32 = vadd.f32 1e-05, %v2031_v59  ;;  %v4944_v30 = vld [vmem:[#allocation17_spill] sm:$0xff] }
 0x37c   :  { %v3436_v7 = vpop.eup %3435  ;;  %3447 = vrsqrt.f32 %v2037_v23  ;;  %v3298_v15 = vpop.f32.mrf.mxu1 }
 0x37d   :  { %2420 = vst [vmem:[#allocation2 + $0x120] sm:$0xff] %v2356_v31  ;;  %v2359_v0 = vadd.f32 %v4675_v33, %v2291_v48  ;;  %v2290_v12 = vmul.f32 %v4669_v45, %v2222_v63  ;;  %v2225_v26 = vmul.f32 %v3436_v7, %v4547_v16  ;;  %3449 = vrsqrt.f32 %v2032_v32  ;;  %v4945_v48 = vld [vmem:[#allocation18_spill] sm:$0xff] }
 0x37e   :  { %v3438_v13 = vpop.eup %3437  ;;  %v2047_v51 = vadd.f32 1e-05, %v3298_v15  ;;  %v2041_v61 = vpop.f32.mrf.mxu1 }
 0x37f   :  { %2423 = vst [vmem:[#allocation2 + $0x138] sm:$0xff] %v2359_v0  ;;  %v2358_v62 = vadd.f32 %v4675_v33, %v2290_v12  ;;  %v2293_v53 = vmul.f32 %v4669_v45, %v2225_v26  ;;  %v2224_v11 = vmul.f32 %v3438_v13, %v4550_v58  ;;  %v2042_v21 = vadd.f32 1e-05, %v2041_v61  ;;  %v4946_v61 = vld [vmem:[#allocation19_spill] sm:$0xff] }
 0x380   :  { %v3440_v43 = vpop.eup %3439  ;;  %3451 = vrsqrt.f32 %v2047_v51  ;;  %v3301_v10 = vpop.f32.mrf.mxu1 }
 0x381   :  { %2422 = vst [vmem:[#allocation2 + $0x130] sm:$0xff] %v2358_v62  ;;  %v2361_v60 = vadd.f32 %v4675_v33, %v2293_v53  ;;  %v2292_v16 = vmul.f32 %v4669_v45, %v2224_v11  ;;  %v2227_v22 = vmul.f32 %v3440_v43, %v4557_v28  ;;  %3453 = vrsqrt.f32 %v2042_v21  ;;  %v4947_v21 = vld [vmem:[#allocation20_spill] sm:$0xff] }
 0x382   :  { %v3442_v39 = vpop.eup %3441  ;;  %v2057_v17 = vadd.f32 1e-05, %v3301_v10  ;;  %v2051_v25 = vpop.f32.mrf.mxu1 }
 0x383   :  { %2425 = vst [vmem:[#allocation2 + $0x148] sm:$0xff] %v2361_v60  ;;  %v2360_v2 = vadd.f32 %v4675_v33, %v2292_v16  ;;  %v2295_v58 = vmul.f32 %v4669_v45, %v2227_v22  ;;  %v2226_v52 = vmul.f32 %v3442_v39, %v4560_v55  ;;  %v2052_v1 = vadd.f32 1e-05, %v2051_v25 }
 0x384   :  { %3455 = vrsqrt.f32 %v2057_v17  ;;  %v3304_v54 = vpop.f32.mrf.mxu1  ;;  %v4948_v17 = vld [vmem:[#allocation21_spill] sm:$0xff] }
 0x385   :  { %v3444_v14 = vpop.eup %3443  ;;  %2424 = vst [vmem:[#allocation2 + $0x140] sm:$0xff] %v2360_v2  ;;  %v2363_v44 = vadd.f32 %v4675_v33, %v2295_v58  ;;  %v2294_v28 = vmul.f32 %v4669_v45, %v2226_v52  ;;  %3457 = vrsqrt.f32 %v2052_v1  ;;  %v2067_v46 = vadd.f32 1e-05, %v3304_v54 }
 0x386   :  { %v3446_v42 = vpop.eup %3445  ;;  %v2229_v50 = vmul.f32 %v3444_v14, %v4567_v37  ;;  %v2061_v5 = vpop.f32.mrf.mxu1 }
 0x387   :  { %2427 = vst [vmem:[#allocation2 + $0x158] sm:$0xff] %v2363_v44  ;;  %v2362_v34 = vadd.f32 %v4675_v33, %v2294_v28  ;;  %v2228_v55 = vmul.f32 %v3446_v42, %v4570_v6  ;;  %3459 = vrsqrt.f32 %v2067_v46  ;;  %v2062_v29 = vadd.f32 1e-05, %v2061_v5  ;;  %v4943_v6 = vld [vmem:[#allocation16_spill] sm:$0xff]  ;;  %v4949_v44 = vld [vmem:[#allocation5_spill] sm:$0xff] }
 0x388   :  { %v2297_v24 = vmul.f32 %v4669_v45, %v2229_v50  ;;  %v3307_v3 = vpop.f32.mrf.mxu1 }
 0x389   :  { %v3448_v4 = vpop.eup %3447  ;;  %2426 = vst [vmem:[#allocation2 + $0x150] sm:$0xff] %v2362_v34  ;;  %v2296_v56 = vmul.f32 %v4669_v45, %v2228_v55  ;;  %3461 = vrsqrt.f32 %v2062_v29  ;;  %v2077_v47 = vadd.f32 1e-05, %v3307_v3  ;;  %v4950_v55 = vld [vmem:[#allocation7_spill] sm:$0xff] }
 0x38a   :  { %v3450_v57 = vpop.eup %3449  ;;  %v2365_v37 = vadd.f32 %v4675_v33, %v2297_v24  ;;  %v2231_v36 = vmul.f32 %v3448_v4, %v4577_v18  ;;  %v2071_v27 = vpop.f32.mrf.mxu1 }
 0x38b   :  { %v2364_v41 = vadd.f32 %v4675_v33, %v2296_v56  ;;  %v2230_v20 = vmul.f32 %v3450_v57, %v4943_v6  ;;  %3463 = vrsqrt.f32 %v2077_v47  ;;  %v2072_v19 = vadd.f32 1e-05, %v2071_v27  ;;  %v4951_v57 = vld [vmem:[#allocation6_spill] sm:$0xff] }
 0x38c   :  { %2429 = vst [vmem:[#allocation2 + $0x168] sm:$0xff] %v2365_v37  ;;  %v2299_v40 = vmul.f32 %v4669_v45, %v2231_v36  ;;  %v3310_v49 = vpop.f32.mrf.mxu1 }
 0x38d   :  { %v3452_v35 = vpop.eup %3451  ;;  %2428 = vst [vmem:[#allocation2 + $0x160] sm:$0xff] %v2364_v41  ;;  %v2298_v9 = vmul.f32 %v4669_v45, %v2230_v20  ;;  %3465 = vrsqrt.f32 %v2072_v19  ;;  %v2087_v8 = vadd.f32 1e-05, %v3310_v49  ;;  %v4952_v20 = vld [vmem:[#allocation9_spill] sm:$0xff] }
 0x38e   :  { %v3454_v38 = vpop.eup %3453  ;;  %v2367_v18 = vadd.f32 %v4675_v33, %v2299_v40  ;;  %v2233_v23 = vmul.f32 %v3452_v35, %v4944_v30  ;;  %v2081_v59 = vpop.f32.mrf.mxu1 }
 0x38f   :  { %v2366_v31 = vadd.f32 %v4675_v33, %v2298_v9  ;;  %v2232_v63 = vmul.f32 %v3454_v38, %v4945_v48  ;;  %3467 = vrsqrt.f32 %v2087_v8  ;;  %v2082_v32 = vadd.f32 1e-05, %v2081_v59  ;;  %v4953_v9 = vld [vmem:[#allocation8_spill] sm:$0xff] }
 0x390   :  { %2431 = vst [vmem:[#allocation2 + $0x178] sm:$0xff] %v2367_v18  ;;  %v2301_v7 = vmul.f32 %v4669_v45, %v2233_v23  ;;  %v3313_v15 = vpop.f32.mrf.mxu1  ;;  %v4954_v23 = vld [vmem:[#allocation11_spill] sm:$0xff] }
 0x391   :  { %v3456_v0 = vpop.eup %3455  ;;  %2430 = vst [vmem:[#allocation2 + $0x170] sm:$0xff] %v2366_v31  ;;  %v2300_v12 = vmul.f32 %v4669_v45, %v2232_v63  ;;  %3469 = vrsqrt.f32 %v2082_v32  ;;  %v2097_v26 = vadd.f32 1e-05, %v3313_v15  ;;  %v4955_v32 = vld [vmem:[#allocation10_spill] sm:$0xff] }
 0x392   :  { %v3458_v13 = vpop.eup %3457  ;;  %v2369_v51 = vadd.f32 %v4675_v33, %v2301_v7  ;;  %v2235_v62 = vmul.f32 %v3456_v0, %v4946_v61  ;;  %v2091_v53 = vpop.f32.mrf.mxu1 }
 0x393   :  { %v2368_v11 = vadd.f32 %v4675_v33, %v2300_v12  ;;  %v2234_v43 = vmul.f32 %v3458_v13, %v4947_v21  ;;  %3471 = vrsqrt.f32 %v2097_v26  ;;  %v2092_v10 = vadd.f32 1e-05, %v2091_v53  ;;  %v4956_v26 = vld [vmem:[#allocation22_spill] sm:$0xff] }
 0x394   :  { %v3460_v60 = vpop.eup %3459  ;;  %2433 = vst [vmem:[#allocation2 + $0x188] sm:$0xff] %v2369_v51  ;;  %v2303_v16 = vmul.f32 %v4669_v45, %v2235_v62  ;;  %v3316_v22 = vpop.f32.mrf.mxu1 }
 0x395   :  { %2432 = vst [vmem:[#allocation2 + $0x180] sm:$0xff] %v2368_v11  ;;  %v2302_v39 = vmul.f32 %v4669_v45, %v2234_v43  ;;  %v2237_v25 = vmul.f32 %v3460_v60, %v4948_v17  ;;  %3473 = vrsqrt.f32 %v2092_v10  ;;  %v2107_v2 = vadd.f32 1e-05, %v3316_v22  ;;  %v4957_v11 = vld [vmem:[#allocation12_spill] sm:$0xff]  ;;  %v4958_v10 = vld [vmem:[#allocation14_spill] sm:$0xff] }
 0x396   :  { %v3462_v58 = vpop.eup %3461  ;;  %v2371_v52 = vadd.f32 %v4675_v33, %v2303_v16  ;;  %v2101_v1 = vpop.f32.mrf.mxu1 }
 0x397   :  { %v2370_v54 = vadd.f32 %v4675_v33, %v2302_v39  ;;  %v2305_v14 = vmul.f32 %v4669_v45, %v2237_v25  ;;  %v2236_v28 = vmul.f32 %v3462_v58, %v4949_v44  ;;  %3475 = vrsqrt.f32 %v2107_v2  ;;  %v4959_v25 = vld [vmem:[#allocation13_spill] sm:$0xff] }
 0x398   :  { %v3464_v46 = vpop.eup %3463  ;;  %2435 = vst [vmem:[#allocation2 + $0x198] sm:$0xff] %v2371_v52  ;;  %v2102_v42 = vadd.f32 1e-05, %v2101_v1  ;;  %v3319_v50 = vpop.f32.mrf.mxu1 }
 0x399   :  { %2434 = vst [vmem:[#allocation2 + $0x190] sm:$0xff] %v2370_v54  ;;  %v2373_v5 = vadd.f32 %v4675_v33, %v2305_v14  ;;  %v2304_v34 = vmul.f32 %v4669_v45, %v2236_v28  ;;  %v2239_v29 = vmul.f32 %v3464_v46, %v4950_v55  ;;  %v2117_v24 = vadd.f32 1e-05, %v3319_v50 }
 0x39a   :  { %v3466_v3 = vpop.eup %3465  ;;  %3477 = vrsqrt.f32 %v2102_v42  ;;  %v2111_v4 = vpop.f32.mrf.mxu1 }
 0x39b   :  { %2437 = vst [vmem:[#allocation2 + $0x1a8] sm:$0xff] %v2373_v5  ;;  %v2372_v56 = vadd.f32 %v4675_v33, %v2304_v34  ;;  %v2307_v47 = vmul.f32 %v4669_v45, %v2239_v29  ;;  %v2238_v37 = vmul.f32 %v3466_v3, %v4951_v57  ;;  %3479 = vrsqrt.f32 %v2117_v24 }
 0x39c   :  { %v3468_v36 = vpop.eup %3467  ;;  %v2112_v27 = vadd.f32 1e-05, %v2111_v4 }
 0x39d   :  { %2436 = vst [vmem:[#allocation2 + $0x1a0] sm:$0xff] %v2372_v56  ;;  %v2375_v41 = vadd.f32 %v4675_v33, %v2307_v47  ;;  %v2306_v6 = vmul.f32 %v4669_v45, %v2238_v37  ;;  %v2241_v19 = vmul.f32 %v3468_v36, %v4952_v20 }
 0x39e   :  { %v3470_v40 = vpop.eup %3469  ;;  %3481 = vrsqrt.f32 %v2112_v27 }
 0x39f   :  { %2439 = vst [vmem:[#allocation2 + $0x1b8] sm:$0xff] %v2375_v41  ;;  %v2374_v49 = vadd.f32 %v4675_v33, %v2306_v6  ;;  %v2309_v35 = vmul.f32 %v4669_v45, %v2241_v19  ;;  %v2240_v8 = vmul.f32 %v3470_v40, %v4953_v9 }
 0x3a0   :  { %v3472_v38 = vpop.eup %3471 }
 0x3a1   :  { %2438 = vst [vmem:[#allocation2 + $0x1b0] sm:$0xff] %v2374_v49  ;;  %v2377_v18 = vadd.f32 %v4675_v33, %v2309_v35  ;;  %v2308_v30 = vmul.f32 %v4669_v45, %v2240_v8  ;;  %v2243_v59 = vmul.f32 %v3472_v38, %v4954_v23 }
 0x3a2   :  { %v3474_v31 = vpop.eup %3473 }
 0x3a3   :  { %2441 = vst [vmem:[#allocation2 + $0x1c8] sm:$0xff] %v2377_v18  ;;  %v2376_v48 = vadd.f32 %v4675_v33, %v2308_v30  ;;  %v2311_v63 = vmul.f32 %v4669_v45, %v2243_v59  ;;  %v2242_v7 = vmul.f32 %v3474_v31, %v4955_v32 }
 0x3a4   :  { %v3476_v15 = vpop.eup %3475 }
 0x3a5   :  { %2440 = vst [vmem:[#allocation2 + $0x1c0] sm:$0xff] %v2376_v48  ;;  %v2379_v0 = vadd.f32 %v4675_v33, %v2311_v63  ;;  %v2310_v12 = vmul.f32 %v4669_v45, %v2242_v7  ;;  %v2245_v13 = vmul.f32 %v3476_v15, %v4956_v26 }
 0x3a7   :  { %v3478_v51 = vpop.eup %3477  ;;  %2443 = vst [vmem:[#allocation2 + $0x1d8] sm:$0xff] %v2379_v0  ;;  %v2378_v61 = vadd.f32 %v4675_v33, %v2310_v12  ;;  %v2313_v62 = vmul.f32 %v4669_v45, %v2245_v13 }
 0x3a8   :  { %v3480_v53 = vpop.eup %3479  ;;  %v2244_v21 = vmul.f32 %v3478_v51, %v4957_v11 }
 0x3a9   :  { %2442 = vst [vmem:[#allocation2 + $0x1d0] sm:$0xff] %v2378_v61  ;;  %v2381_v43 = vadd.f32 %v4675_v33, %v2313_v62  ;;  %v2247_v60 = vmul.f32 %v3480_v53, %v4958_v10 }
 0x3aa   :  { %v2312_v16 = vmul.f32 %v4669_v45, %v2244_v21 }
 0x3ab   :  { %v3482_v22 = vpop.eup %3481  ;;  %2445 = vst [vmem:[#allocation2 + $0x1e8] sm:$0xff] %v2381_v43  ;;  %v2315_v39 = vmul.f32 %v4669_v45, %v2247_v60 }
 0x3ac   :  { %v2380_v17 = vadd.f32 %v4675_v33, %v2312_v16  ;;  %v2246_v2 = vmul.f32 %v3482_v22, %v4959_v25 }
 0x3ad   :  { %v2383_v58 = vadd.f32 %v4675_v33, %v2315_v39 }
 0x3ae   :  { %2444 = vst [vmem:[#allocation2 + $0x1e0] sm:$0xff] %v2380_v17  ;;  %v2314_v52 = vmul.f32 %v4669_v45, %v2246_v2 }
 0x3af   :  { %2447 = vst [vmem:[#allocation2 + $0x1f8] sm:$0xff] %v2383_v58 }
 0x3b0   :  { %v2382_v1 = vadd.f32 %v4675_v33, %v2314_v52 }
 0x3b2   :  { %2446 = vst [vmem:[#allocation2 + $0x1f0] sm:$0xff] %v2382_v1 }
 0x3b3   :  { %3494 = shalt.err (!%p3491_p4)
}
 0x3b4   :  { %s3506_s2 = smov 128   ;;  %s3507_s5 = smov 8  }
 0x3b5   :  { %2459 = dma.vmem_to_hbm [thread:$0]  %s2454_s29, 8192, %s4875_s4, [#allocation3], %s3506_s2, %s3506_s2, %s3507_s5  }
 0x3b6   :  { %3503 = dma.done.wait [#allocation3], 8192  }
 0x3b7   :  { %3504 = vsyncadd [#allocation3], 4294959104 }
 0x3b8   :  { %2463 = vsyncpa [#allocation3], 1 }

</bundles_post_ra>
